<compile_context>
chip_gen: v7x
topology: tpu7x:2x2x1
jax: 0.10.0
libtpu: 0.0.40
codegen_flags: <defaults>
</compile_context>

<pallas_src>
import functools

import jax
import jax.numpy as jnp
from jax.experimental import pallas as pl
from jax.experimental.pallas import tpu as pltpu


# ----------------------------------------------------------------------------
# Pallas kernel: WriteUnit forward for one batch tile of TB rows.
# ----------------------------------------------------------------------------
def write_unit_kernel(
    retrieved_ref,    # [TB, D]     f32
    ctrl_last_ref,    # [TB, D]     f32   == controls[-1]
    prev_mem_ref,     # [TB, D]     f32   == memories[-1] (kept full precision)
    ctrls_prev_ref,   # [K, TB, D]  bf16  == stack(controls[:-1])
    mems_ref,         # [K, TB, D]  bf16  == stack(memories)
    w_cat_r_ref,      # [D, D]      bf16  first half of concat weight (retrieved)
    w_cat_m_ref,      # [D, D]      bf16  second half of concat weight (prev_mem)
    b_cat_ref,        # [1, D]      f32
    w_attn_ref,       # [1, D]      f32   Linear(D -> 1) weight (row form)
    b_attn_ref,       # [1]         f32   (SMEM scalar)
    w_mem_ref,        # [D, D]      bf16
    b_mem_ref,        # [1, D]      f32
    w_gate_ref,       # [1, D]      f32   Linear(D -> 1) weight (row form)
    b_gate_ref,       # [1]         f32   (SMEM scalar)
    out_ref,          # [TB, D]     f32
):
    K = ctrls_prev_ref.shape[0]
    retrieved = retrieved_ref[...]
    ctrl_last = ctrl_last_ref[...]
    prev_mem = prev_mem_ref[...]

    # ---- concat = Linear(2D -> D)(cat([retrieved, prev_mem], dim=1)) ----
    # cat-then-matmul == split matmul with the two halves of the weight.
    # bf16 MXU operands, f32 accumulation.
    concat = (
        jnp.dot(retrieved.astype(jnp.bfloat16), w_cat_r_ref[...],
                preferred_element_type=jnp.float32)
        + jnp.dot(prev_mem.astype(jnp.bfloat16), w_cat_m_ref[...],
                  preferred_element_type=jnp.float32)
        + b_cat_ref[...]
    )

    # ---- self-attention over the K previous steps ----
    # Fold w_attn into ctrl_last once: removes a full [K,TB,D] multiply pass.
    wl = ctrl_last * w_attn_ref[...]                       # [TB, D] f32
    b_attn = b_attn_ref[0]

    # Pass 1: per-step logits.  Static Python loop over (small) K so no
    # [K, TB, D] f32 temporaries are ever materialized in VMEM.
    logits = []
    for k in range(K):
        ck = ctrls_prev_ref[k].astype(jnp.float32)         # [TB, D]
        logits.append(jnp.sum(wl * ck, axis=-1, keepdims=True) + b_attn)  # [TB,1]

    # softmax over the K (step) axis, matching F.softmax(attn, dim=1).
    m = logits[0]
    for k in range(1, K):
        m = jnp.maximum(m, logits[k])
    exps = [jnp.exp(l - m) for l in logits]                # K x [TB, 1]
    denom = exps[0]
    for k in range(1, K):
        denom = denom + exps[k]
    # Exact reciprocal: [TB,1] vector -> negligible cost, avoids stacking the
    # approx-reciprocal error on top of the bf16 input quantization.
    inv = 1.0 / denom                                      # [TB, 1]

    # Pass 2: attention-weighted sum of memories, one [TB, D] accumulator.
    attn_mem = (exps[0] * inv) * mems_ref[0].astype(jnp.float32)
    for k in range(1, K):
        attn_mem = attn_mem + (exps[k] * inv) * mems_ref[k].astype(jnp.float32)

    next_mem = (
        jnp.dot(attn_mem.astype(jnp.bfloat16), w_mem_ref[...],
                preferred_element_type=jnp.float32)
        + b_mem_ref[...]
        + concat
    )

    # ---- memory gate ----
    gate_logit = (
        jnp.sum(ctrl_last * w_gate_ref[...], axis=-1, keepdims=True)  # [TB, 1]
        + b_gate_ref[0]
    )
    gate = jax.nn.sigmoid(gate_logit)
    # gate*prev + (1-gate)*next  ==  next + gate*(prev - next)
    out_ref[...] = next_mem + gate * (prev_mem - next_mem)


# ----------------------------------------------------------------------------
# VMEM sizing helpers (generation-aware: v7x = 64 MiB/TC, v5e/v6e = 128 MiB).
# ----------------------------------------------------------------------------
def _device_vmem_capacity_bytes():
    try:
        return int(pltpu.get_tpu_info().vmem_capacity_bytes)
    except Exception:
        return 64 * 1024 * 1024   # conservative: v7x per-TensorCore (smallest)


def _estimate_vmem_bytes(K, tb, D, single_buffer_weights):
    f32, bf16 = 4, 2
    # double-buffered per-grid-step activation blocks
    acts = 2 * (3 * tb * D * f32          # retrieved, ctrl_last, prev_mem (f32)
                + 2 * K * tb * D * bf16   # ctrls_prev, mems (bf16 streams)
                + tb * D * f32)           # output tile
    wbufs = 1 if single_buffer_weights else 2
    weights = wbufs * (3 * D * D * bf16   # w_cat_r, w_cat_m, w_mem
                       + 4 * 8 * D * f32)  # four (1,D) rows, padded sublanes
    return acts + weights


def _choose_block_b(K, B, D, vmem_cap):
    """Largest batch tile whose pipeline fits in ~half of VMEM; prefer an even
    grid of >= 2 steps so ("parallel",) balances both v7x TensorCores."""
    budget = vmem_cap // 2
    cands = [tb for tb in range(8, B + 1, 8) if B % tb == 0]
    if not cands:
        return B
    fitting = [tb for tb in cands if _estimate_vmem_bytes(K, tb, D, True) <= budget]
    if not fitting:
        return cands[0]
    even = [tb for tb in fitting if (B // tb) >= 2 and (B // tb) % 2 == 0]
    return max(even) if even else max(fitting)


# ----------------------------------------------------------------------------
# Wrapper: batch-tiled pallas_call with resident (single-buffered) weights.
# ----------------------------------------------------------------------------
@functools.partial(
    jax.jit,
    static_argnames=("block_b", "vmem_limit_bytes", "single_buffer_weights"))
def _write_unit_impl(mems_bf16, ctrls_prev_bf16, prev_mem, ctrl_last, retrieved,
                     params, *, block_b, vmem_limit_bytes, single_buffer_weights):
    K, B, D = mems_bf16.shape
    tb = block_b
    grid = (B // tb,)

    res_kw = {"pipeline_mode": pl.Buffered(1)} if single_buffer_weights else {}

    row_spec = pl.BlockSpec((tb, D), lambda i: (i, 0))          # per-tile activations
    stk_spec = pl.BlockSpec((K, tb, D), lambda i: (0, i, 0))    # per-tile bf16 stacks
    wmat_spec = pl.BlockSpec((D, D), lambda i: (0, 0), **res_kw)    # resident weights
    brow_spec = pl.BlockSpec((1, D), lambda i: (0, 0), **res_kw)    # resident bias rows
    smem_spec = pl.BlockSpec(memory_space=pltpu.MemorySpace.SMEM)   # scalar biases

    return pl.pallas_call(
        write_unit_kernel,
        out_shape=jax.ShapeDtypeStruct((B, D), jnp.float32),
        grid=grid,
        in_specs=[
            row_spec,            # retrieved
            row_spec,            # ctrl_last
            row_spec,            # prev_mem (f32)
            stk_spec,            # ctrls_prev (bf16)
            stk_spec,            # mems (bf16)
            wmat_spec,           # w_cat_r (bf16)
            wmat_spec,           # w_cat_m (bf16)
            brow_spec,           # b_cat
            brow_spec,           # w_attn
            smem_spec,           # b_attn (SMEM scalar)
            wmat_spec,           # w_mem (bf16)
            brow_spec,           # b_mem
            brow_spec,           # w_gate
            smem_spec,           # b_gate (SMEM scalar)
        ],
        out_specs=pl.BlockSpec((tb, D), lambda i: (i, 0)),
        compiler_params=pltpu.CompilerParams(
            dimension_semantics=("parallel",),       # shard batch tiles across TCs
            vmem_limit_bytes=vmem_limit_bytes,
        ),
    )(
        retrieved, ctrl_last, prev_mem, ctrls_prev_bf16, mems_bf16,
        params["w_cat_r"], params["w_cat_m"], params["b_cat"],
        params["w_attn"], params["b_attn"],
        params["w_mem"], params["b_mem"],
        params["w_gate"], params["b_gate"],
    )


def write_unit_pallas(mems_bf16, ctrls_prev_bf16, prev_mem, ctrl_last, retrieved,
                      params, *, block_b=None):
    """mems_bf16 / ctrls_prev_bf16: [K, B, D] bf16 stacked memories / controls[:-1];
    prev_mem: [B, D] f32 == memories[-1]; ctrl_last: [B, D] f32 == controls[-1];
    params: from prepare_params() (matmul weights already bf16)."""
    K, B, D = mems_bf16.shape
    assert D % 128 == 0, "feature dim must be lane-dense (multiple of 128)"

    vmem_cap = _device_vmem_capacity_bytes()
    if block_b is None:
        block_b = _choose_block_b(K, B, D, vmem_cap)
    assert B % block_b == 0 and (block_b % 8 == 0 or block_b == B)

    est = _estimate_vmem_bytes(K, block_b, D, True)
    vmem_limit = int(min(vmem_cap * 3 // 4, max(est + (8 << 20), 32 << 20)))

    try:
        return _write_unit_impl(
            mems_bf16, ctrls_prev_bf16, prev_mem, ctrl_last, retrieved, params,
            block_b=block_b, vmem_limit_bytes=vmem_limit,
            single_buffer_weights=True)
    except Exception:
        # This jax version rejects pl.Buffered(1) on constant-index blocks:
        # fall back to default double-buffering (correctness unchanged).
        return _write_unit_impl(
            mems_bf16, ctrls_prev_bf16, prev_mem, ctrl_last, retrieved, params,
            block_b=block_b, vmem_limit_bytes=vmem_limit,
            single_buffer_weights=False)


# ----------------------------------------------------------------------------
# Pure-JAX f32 reference mirroring the PyTorch forward exactly.
# ----------------------------------------------------------------------------
def write_unit_ref(mems, ctrls_prev, ctrl_last, retrieved, params):
    prev_mem = mems[-1]
    w_cat = jnp.concatenate([params["w_cat_r"], params["w_cat_m"]], axis=0)  # [2D, D]
    concat = jnp.concatenate([retrieved, prev_mem], axis=1) @ w_cat + params["b_cat"]
    # self attention (PyTorch layout: stack along dim=2)
    controls_cat = jnp.transpose(ctrls_prev, (1, 2, 0))         # [B, D, K]
    attn = ctrl_last[:, :, None] * controls_cat                 # [B, D, K]
    attn = jnp.transpose(attn, (0, 2, 1)) @ params["w_attn"].T + params["b_attn"]  # [B,K,1]
    attn = jax.nn.softmax(attn, axis=1)
    attn = jnp.transpose(attn, (0, 2, 1))                       # [B, 1, K]
    memories_cat = jnp.transpose(mems, (1, 2, 0))               # [B, D, K]
    attn_mem = jnp.sum(attn * memories_cat, axis=2)             # [B, D]
    next_mem = attn_mem @ params["w_mem"] + params["b_mem"] + concat
    # memory gate
    gate = jax.nn.sigmoid(ctrl_last @ params["w_gate"].T + params["b_gate"])
    return gate * prev_mem + (1.0 - gate) * next_mem


# ----------------------------------------------------------------------------
# Deterministic parameter init (xavier_uniform_ weights, zero biases).
# ----------------------------------------------------------------------------
def xavier_uniform(key, fan_in, fan_out, shape):
    bound = (6.0 / (fan_in + fan_out)) ** 0.5
    return jax.random.uniform(key, shape, jnp.float32, -bound, bound)


def init_params(key, dim):
    k_cat, k_attn, k_mem, k_gate = jax.random.split(key, 4)
    w_cat = xavier_uniform(k_cat, 2 * dim, dim, (2 * dim, dim))   # [in, out]
    return {
        "w_cat_r": w_cat[:dim],
        "w_cat_m": w_cat[dim:],
        "b_cat": jnp.zeros((1, dim), jnp.float32),
        "w_attn": xavier_uniform(k_attn, dim, 1, (1, dim)),       # row form
        "b_attn": jnp.zeros((1,), jnp.float32),
        "w_mem": xavier_uniform(k_mem, dim, dim, (dim, dim)),
        "b_mem": jnp.zeros((1, dim), jnp.float32),
        "w_gate": xavier_uniform(k_gate, dim, 1, (1, dim)),       # row form
        "b_gate": jnp.zeros((1,), jnp.float32),
    }


def prepare_params(params_f32):
    """Pre-cast the [D, D] matmul weights to bf16 ONCE (outside jit), so there
    is no per-call convert + HBM copy."""
    p = dict(params_f32)
    p["w_cat_r"] = params_f32["w_cat_r"].astype(jnp.bfloat16)
    p["w_cat_m"] = params_f32["w_cat_m"].astype(jnp.bfloat16)
    p["w_mem"] = params_f32["w_mem"].astype(jnp.bfloat16)
    return p


if __name__ == "__main__":
    # Small but layout-friendly demo: lane-dense D (multiple of 128) and a
    # batch tile of 8 rows -> even 2-step grid (balances both v7x TensorCores).
    B, D, K = 16, 128, 3   # batch, hidden dim, number of previous MAC steps
    TB = 8                 # demo tile; at real sizes leave block_b=None (auto)

    key = jax.random.PRNGKey(0)
    k_params, k_mem, k_ret, k_ctrl = jax.random.split(key, 4)
    params_f32 = init_params(k_params, D)
    params = prepare_params(params_f32)

    mems = jax.random.normal(k_mem, (K, B, D), jnp.float32)
    ctrls = jax.random.normal(k_ctrl, (K + 1, B, D), jnp.float32)
    ctrls_prev, ctrl_last = ctrls[:K], ctrls[K]
    retrieved = jax.random.normal(k_ret, (B, D), jnp.float32)

    # The dominant [K, B, D] streams are handed to the kernel in bf16 (cast
    # once here, by the caller); prev_mem stays f32 for concat + gate blend.
    mems_bf16 = mems.astype(jnp.bfloat16)
    ctrls_prev_bf16 = ctrls_prev.astype(jnp.bfloat16)
    prev_mem = mems[-1]

    out = write_unit_pallas(mems_bf16, ctrls_prev_bf16, prev_mem, ctrl_last,
                            retrieved, params, block_b=TB)
    out = jax.block_until_ready(out)

    ref = write_unit_ref(mems, ctrls_prev, ctrl_last, retrieved, params_f32)
    assert out.shape == (B, D)
    # bf16 MXU operands + bf16-streamed mems/ctrls_prev vs pure-f32 reference:
    # loosened tolerance; f32 accumulation + exact softmax keep the error small.
    max_err = jnp.max(jnp.abs(out - ref))
    assert jnp.allclose(out, ref, rtol=5e-2, atol=5e-2), f"max abs err = {max_err}"
    print("KERNEL_OK")
</pallas_src>

<mosaic_0001>
module attributes {stable_mosaic.version = 11 : i64} {
  func.func @write_unit_kernel(%arg0: i32, %arg1: memref<8x128xf32, #tpu.memory_space<vmem>>, %arg2: memref<8x128xf32, #tpu.memory_space<vmem>>, %arg3: memref<8x128xf32, #tpu.memory_space<vmem>>, %arg4: memref<3x8x128xbf16, #tpu.memory_space<vmem>>, %arg5: memref<3x8x128xbf16, #tpu.memory_space<vmem>>, %arg6: memref<128x128xbf16, #tpu.memory_space<vmem>>, %arg7: memref<128x128xbf16, #tpu.memory_space<vmem>>, %arg8: memref<1x128xf32, #tpu.memory_space<vmem>>, %arg9: memref<1x128xf32, #tpu.memory_space<vmem>>, %arg10: memref<1xf32, #tpu.memory_space<smem>>, %arg11: memref<128x128xbf16, #tpu.memory_space<vmem>>, %arg12: memref<1x128xf32, #tpu.memory_space<vmem>>, %arg13: memref<1x128xf32, #tpu.memory_space<vmem>>, %arg14: memref<1xf32, #tpu.memory_space<smem>>, %arg15: memref<8x128xf32, #tpu.memory_space<vmem>>) attributes {dimension_semantics = [#tpu.dimension_semantics<parallel>], iteration_bounds = array<i64: 2>, scalar_prefetch = 0 : i64, scratch_operands = 0 : i64, tpu.core_type = #tpu.core_type<tc>, window_params = [{transform_indices = @transform_0, window_bounds = array<i64: 8, 128>}, {transform_indices = @transform_1, window_bounds = array<i64: 8, 128>}, {transform_indices = @transform_2, window_bounds = array<i64: 8, 128>}, {transform_indices = @transform_3, window_bounds = array<i64: 3, 8, 128>}, {transform_indices = @transform_4, window_bounds = array<i64: 3, 8, 128>}, {pipeline_mode = #tpu.pipeline_mode<synchronous>, transform_indices = @transform_5, window_bounds = array<i64: 128, 128>}, {pipeline_mode = #tpu.pipeline_mode<synchronous>, transform_indices = @transform_6, window_bounds = array<i64: 128, 128>}, {pipeline_mode = #tpu.pipeline_mode<synchronous>, transform_indices = @transform_7, window_bounds = array<i64: 1, 128>}, {pipeline_mode = #tpu.pipeline_mode<synchronous>, transform_indices = @transform_8, window_bounds = array<i64: 1, 128>}, {transform_indices = @transform_9, window_bounds = array<i64: 1>}, {pipeline_mode = #tpu.pipeline_mode<synchronous>, transform_indices = @transform_10, window_bounds = array<i64: 128, 128>}, {pipeline_mode = #tpu.pipeline_mode<synchronous>, transform_indices = @transform_11, window_bounds = array<i64: 1, 128>}, {pipeline_mode = #tpu.pipeline_mode<synchronous>, transform_indices = @transform_12, window_bounds = array<i64: 1, 128>}, {transform_indices = @transform_13, window_bounds = array<i64: 1>}, {transform_indices = @transform_14, window_bounds = array<i64: 8, 128>}]} {
    %c0 = arith.constant 0 : index
    %c0_0 = arith.constant 0 : index
    %0 = vector.load %arg1[%c0, %c0_0] : memref<8x128xf32, #tpu.memory_space<vmem>>, vector<8x128xf32>
    %c0_1 = arith.constant 0 : index
    %c0_2 = arith.constant 0 : index
    %1 = vector.load %arg2[%c0_1, %c0_2] : memref<8x128xf32, #tpu.memory_space<vmem>>, vector<8x128xf32>
    %c0_3 = arith.constant 0 : index
    %c0_4 = arith.constant 0 : index
    %2 = vector.load %arg3[%c0_3, %c0_4] : memref<8x128xf32, #tpu.memory_space<vmem>>, vector<8x128xf32>
    %3 = arith.truncf %0 : vector<8x128xf32> to vector<8x128xbf16>
    %c0_5 = arith.constant 0 : index
    %c0_6 = arith.constant 0 : index
    %4 = vector.load %arg6[%c0_5, %c0_6] : memref<128x128xbf16, #tpu.memory_space<vmem>>, vector<128x128xbf16>
    %cst = arith.constant dense<0.000000e+00> : vector<8x128xf32>
    %5 = tpu.matmul %3, %4, %cst {dimension_numbers = #tpu.dot_dimension_numbers<[1], [0], [0], [1], [0, 0, 1, 1], [], []>} : vector<8x128xbf16>, vector<128x128xbf16>, vector<8x128xf32> -> vector<8x128xf32>
    %6 = arith.truncf %2 : vector<8x128xf32> to vector<8x128xbf16>
    %c0_7 = arith.constant 0 : index
    %c0_8 = arith.constant 0 : index
    %7 = vector.load %arg7[%c0_7, %c0_8] : memref<128x128xbf16, #tpu.memory_space<vmem>>, vector<128x128xbf16>
    %cst_9 = arith.constant dense<0.000000e+00> : vector<8x128xf32>
    %8 = tpu.matmul %6, %7, %cst_9 {dimension_numbers = #tpu.dot_dimension_numbers<[1], [0], [0], [1], [0, 0, 1, 1], [], []>} : vector<8x128xbf16>, vector<128x128xbf16>, vector<8x128xf32> -> vector<8x128xf32>
    %9 = arith.addf %5, %8 : vector<8x128xf32>
    %c0_10 = arith.constant 0 : index
    %c0_11 = arith.constant 0 : index
    %10 = vector.load %arg8[%c0_10, %c0_11] : memref<1x128xf32, #tpu.memory_space<vmem>>, vector<1x128xf32>
    %11 = vector.broadcast %10 : vector<1x128xf32> to vector<8x128xf32>
    %12 = arith.addf %9, %11 : vector<8x128xf32>
    %c0_12 = arith.constant 0 : index
    %c0_13 = arith.constant 0 : index
    %13 = vector.load %arg9[%c0_12, %c0_13] : memref<1x128xf32, #tpu.memory_space<vmem>>, vector<1x128xf32>
    %14 = vector.broadcast %13 : vector<1x128xf32> to vector<8x128xf32>
    %15 = arith.mulf %1, %14 : vector<8x128xf32>
    %c0_14 = arith.constant 0 : index
    %16 = memref.load %arg10[%c0_14] : memref<1xf32, #tpu.memory_space<smem>>
    %c0_15 = arith.constant 0 : index
    %c0_16 = arith.constant 0 : index
    %c0_17 = arith.constant 0 : index
    %17 = vector.load %arg4[%c0_15, %c0_16, %c0_17] : memref<3x8x128xbf16, #tpu.memory_space<vmem>>, vector<1x8x128xbf16>
    %18 = vector.shape_cast %17 : vector<1x8x128xbf16> to vector<8x128xbf16>
    %19 = arith.extf %18 : vector<8x128xbf16> to vector<8x128xf32>
    %20 = arith.mulf %15, %19 : vector<8x128xf32>
    %cst_18 = arith.constant dense<0.000000e+00> : vector<8xf32>
    %21 = vector.multi_reduction <add>, %20, %cst_18 [1] : vector<8x128xf32> to vector<8xf32>
    %22 = vector.shape_cast %21 : vector<8xf32> to vector<8x1xf32>
    %23 = vector.broadcast %16 : f32 to vector<8x1xf32>
    %24 = arith.addf %22, %23 : vector<8x1xf32>
    %c1 = arith.constant 1 : index
    %c0_19 = arith.constant 0 : index
    %c0_20 = arith.constant 0 : index
    %25 = vector.load %arg4[%c1, %c0_19, %c0_20] : memref<3x8x128xbf16, #tpu.memory_space<vmem>>, vector<1x8x128xbf16>
    %26 = vector.shape_cast %25 : vector<1x8x128xbf16> to vector<8x128xbf16>
    %27 = arith.extf %26 : vector<8x128xbf16> to vector<8x128xf32>
    %28 = arith.mulf %15, %27 : vector<8x128xf32>
    %cst_21 = arith.constant dense<0.000000e+00> : vector<8xf32>
    %29 = vector.multi_reduction <add>, %28, %cst_21 [1] : vector<8x128xf32> to vector<8xf32>
    %30 = vector.shape_cast %29 : vector<8xf32> to vector<8x1xf32>
    %31 = vector.broadcast %16 : f32 to vector<8x1xf32>
    %32 = arith.addf %30, %31 : vector<8x1xf32>
    %c2 = arith.constant 2 : index
    %c0_22 = arith.constant 0 : index
    %c0_23 = arith.constant 0 : index
    %33 = vector.load %arg4[%c2, %c0_22, %c0_23] : memref<3x8x128xbf16, #tpu.memory_space<vmem>>, vector<1x8x128xbf16>
    %34 = vector.shape_cast %33 : vector<1x8x128xbf16> to vector<8x128xbf16>
    %35 = arith.extf %34 : vector<8x128xbf16> to vector<8x128xf32>
    %36 = arith.mulf %15, %35 : vector<8x128xf32>
    %cst_24 = arith.constant dense<0.000000e+00> : vector<8xf32>
    %37 = vector.multi_reduction <add>, %36, %cst_24 [1] : vector<8x128xf32> to vector<8xf32>
    %38 = vector.shape_cast %37 : vector<8xf32> to vector<8x1xf32>
    %39 = vector.broadcast %16 : f32 to vector<8x1xf32>
    %40 = arith.addf %38, %39 : vector<8x1xf32>
    %41 = arith.maximumf %24, %32 : vector<8x1xf32>
    %42 = arith.maximumf %41, %40 : vector<8x1xf32>
    %43 = arith.subf %24, %42 : vector<8x1xf32>
    %44 = math.exp %43 : vector<8x1xf32>
    %45 = arith.subf %32, %42 : vector<8x1xf32>
    %46 = math.exp %45 : vector<8x1xf32>
    %47 = arith.subf %40, %42 : vector<8x1xf32>
    %48 = math.exp %47 : vector<8x1xf32>
    %49 = arith.addf %44, %46 : vector<8x1xf32>
    %50 = arith.addf %49, %48 : vector<8x1xf32>
    %cst_25 = arith.constant 1.000000e+00 : f32
    %51 = vector.broadcast %cst_25 : f32 to vector<8x1xf32>
    %52 = arith.divf %51, %50 : vector<8x1xf32>
    %53 = arith.mulf %44, %52 : vector<8x1xf32>
    %c0_26 = arith.constant 0 : index
    %c0_27 = arith.constant 0 : index
    %c0_28 = arith.constant 0 : index
    %54 = vector.load %arg5[%c0_26, %c0_27, %c0_28] : memref<3x8x128xbf16, #tpu.memory_space<vmem>>, vector<1x8x128xbf16>
    %55 = vector.shape_cast %54 : vector<1x8x128xbf16> to vector<8x128xbf16>
    %56 = arith.extf %55 : vector<8x128xbf16> to vector<8x128xf32>
    %57 = vector.broadcast %53 : vector<8x1xf32> to vector<8x128xf32>
    %58 = arith.mulf %57, %56 : vector<8x128xf32>
    %59 = arith.mulf %46, %52 : vector<8x1xf32>
    %c1_29 = arith.constant 1 : index
    %c0_30 = arith.constant 0 : index
    %c0_31 = arith.constant 0 : index
    %60 = vector.load %arg5[%c1_29, %c0_30, %c0_31] : memref<3x8x128xbf16, #tpu.memory_space<vmem>>, vector<1x8x128xbf16>
    %61 = vector.shape_cast %60 : vector<1x8x128xbf16> to vector<8x128xbf16>
    %62 = arith.extf %61 : vector<8x128xbf16> to vector<8x128xf32>
    %63 = vector.broadcast %59 : vector<8x1xf32> to vector<8x128xf32>
    %64 = arith.mulf %63, %62 : vector<8x128xf32>
    %65 = arith.addf %58, %64 : vector<8x128xf32>
    %66 = arith.mulf %48, %52 : vector<8x1xf32>
    %c2_32 = arith.constant 2 : index
    %c0_33 = arith.constant 0 : index
    %c0_34 = arith.constant 0 : index
    %67 = vector.load %arg5[%c2_32, %c0_33, %c0_34] : memref<3x8x128xbf16, #tpu.memory_space<vmem>>, vector<1x8x128xbf16>
    %68 = vector.shape_cast %67 : vector<1x8x128xbf16> to vector<8x128xbf16>
    %69 = arith.extf %68 : vector<8x128xbf16> to vector<8x128xf32>
    %70 = vector.broadcast %66 : vector<8x1xf32> to vector<8x128xf32>
    %71 = arith.mulf %70, %69 : vector<8x128xf32>
    %72 = arith.addf %65, %71 : vector<8x128xf32>
    %73 = arith.truncf %72 : vector<8x128xf32> to vector<8x128xbf16>
    %c0_35 = arith.constant 0 : index
    %c0_36 = arith.constant 0 : index
    %74 = vector.load %arg11[%c0_35, %c0_36] : memref<128x128xbf16, #tpu.memory_space<vmem>>, vector<128x128xbf16>
    %cst_37 = arith.constant dense<0.000000e+00> : vector<8x128xf32>
    %75 = tpu.matmul %73, %74, %cst_37 {dimension_numbers = #tpu.dot_dimension_numbers<[1], [0], [0], [1], [0, 0, 1, 1], [], []>} : vector<8x128xbf16>, vector<128x128xbf16>, vector<8x128xf32> -> vector<8x128xf32>
    %c0_38 = arith.constant 0 : index
    %c0_39 = arith.constant 0 : index
    %76 = vector.load %arg12[%c0_38, %c0_39] : memref<1x128xf32, #tpu.memory_space<vmem>>, vector<1x128xf32>
    %77 = vector.broadcast %76 : vector<1x128xf32> to vector<8x128xf32>
    %78 = arith.addf %75, %77 : vector<8x128xf32>
    %79 = arith.addf %78, %12 : vector<8x128xf32>
    %c0_40 = arith.constant 0 : index
    %c0_41 = arith.constant 0 : index
    %80 = vector.load %arg13[%c0_40, %c0_41] : memref<1x128xf32, #tpu.memory_space<vmem>>, vector<1x128xf32>
    %81 = vector.broadcast %80 : vector<1x128xf32> to vector<8x128xf32>
    %82 = arith.mulf %1, %81 : vector<8x128xf32>
    %cst_42 = arith.constant dense<0.000000e+00> : vector<8xf32>
    %83 = vector.multi_reduction <add>, %82, %cst_42 [1] : vector<8x128xf32> to vector<8xf32>
    %84 = vector.shape_cast %83 : vector<8xf32> to vector<8x1xf32>
    %c0_43 = arith.constant 0 : index
    %85 = memref.load %arg14[%c0_43] : memref<1xf32, #tpu.memory_space<smem>>
    %86 = vector.broadcast %85 : f32 to vector<8x1xf32>
    %87 = arith.addf %84, %86 : vector<8x1xf32>
    %88 = arith.negf %87 : vector<8x1xf32>
    %89 = math.exp %88 : vector<8x1xf32>
    %cst_44 = arith.constant 1.000000e+00 : f32
    %90 = vector.broadcast %cst_44 : f32 to vector<8x1xf32>
    %91 = arith.addf %90, %89 : vector<8x1xf32>
    %92 = arith.divf %90, %91 : vector<8x1xf32>
    %93 = arith.subf %2, %79 : vector<8x128xf32>
    %94 = vector.broadcast %92 : vector<8x1xf32> to vector<8x128xf32>
    %95 = arith.mulf %94, %93 : vector<8x128xf32>
    %96 = arith.addf %79, %95 : vector<8x128xf32>
    %c0_45 = arith.constant 0 : index
    %c0_46 = arith.constant 0 : index
    %97 = vector.load %arg15[%c0_45, %c0_46] : memref<8x128xf32, #tpu.memory_space<vmem>>, vector<8x128xf32>
    tpu.vector_store %arg15[%c0_45, %c0_46], %96 {strides = array<i32>} : memref<8x128xf32, #tpu.memory_space<vmem>>, vector<8x128xf32>,
    return
  }
  func.func @transform_0(%arg0: i32) -> (i32, i32) {
    %c0_i32 = arith.constant 0 : i32
    %c0_i32_0 = arith.constant 0 : i32
    return %arg0, %c0_i32 : i32, i32
  }
  func.func @transform_1(%arg0: i32) -> (i32, i32) {
    %c0_i32 = arith.constant 0 : i32
    %c0_i32_0 = arith.constant 0 : i32
    return %arg0, %c0_i32 : i32, i32
  }
  func.func @transform_2(%arg0: i32) -> (i32, i32) {
    %c0_i32 = arith.constant 0 : i32
    %c0_i32_0 = arith.constant 0 : i32
    return %arg0, %c0_i32 : i32, i32
  }
  func.func @transform_3(%arg0: i32) -> (i32, i32, i32) {
    %c0_i32 = arith.constant 0 : i32
    %c0_i32_0 = arith.constant 0 : i32
    %c0_i32_1 = arith.constant 0 : i32
    return %c0_i32, %arg0, %c0_i32_0 : i32, i32, i32
  }
  func.func @transform_4(%arg0: i32) -> (i32, i32, i32) {
    %c0_i32 = arith.constant 0 : i32
    %c0_i32_0 = arith.constant 0 : i32
    %c0_i32_1 = arith.constant 0 : i32
    return %c0_i32, %arg0, %c0_i32_0 : i32, i32, i32
  }
  func.func @transform_5(%arg0: i32) -> (i32, i32) {
    %c0_i32 = arith.constant 0 : i32
    %c0_i32_0 = arith.constant 0 : i32
    %c0_i32_1 = arith.constant 0 : i32
    return %c0_i32, %c0_i32_0 : i32, i32
  }
  func.func @transform_6(%arg0: i32) -> (i32, i32) {
    %c0_i32 = arith.constant 0 : i32
    %c0_i32_0 = arith.constant 0 : i32
    %c0_i32_1 = arith.constant 0 : i32
    return %c0_i32, %c0_i32_0 : i32, i32
  }
  func.func @transform_7(%arg0: i32) -> (i32, i32) {
    %c0_i32 = arith.constant 0 : i32
    %c0_i32_0 = arith.constant 0 : i32
    %c0_i32_1 = arith.constant 0 : i32
    return %c0_i32, %c0_i32_0 : i32, i32
  }
  func.func @transform_8(%arg0: i32) -> (i32, i32) {
    %c0_i32 = arith.constant 0 : i32
    %c0_i32_0 = arith.constant 0 : i32
    %c0_i32_1 = arith.constant 0 : i32
    return %c0_i32, %c0_i32_0 : i32, i32
  }
  func.func @transform_9(%arg0: i32) -> i32 {
    %c0_i32 = arith.constant 0 : i32
    %c0_i32_0 = arith.constant 0 : i32
    return %c0_i32 : i32
  }
  func.func @transform_10(%arg0: i32) -> (i32, i32) {
    %c0_i32 = arith.constant 0 : i32
    %c0_i32_0 = arith.constant 0 : i32
    %c0_i32_1 = arith.constant 0 : i32
    return %c0_i32, %c0_i32_0 : i32, i32
  }
  func.func @transform_11(%arg0: i32) -> (i32, i32) {
    %c0_i32 = arith.constant 0 : i32
    %c0_i32_0 = arith.constant 0 : i32
    %c0_i32_1 = arith.constant 0 : i32
    return %c0_i32, %c0_i32_0 : i32, i32
  }
  func.func @transform_12(%arg0: i32) -> (i32, i32) {
    %c0_i32 = arith.constant 0 : i32
    %c0_i32_0 = arith.constant 0 : i32
    %c0_i32_1 = arith.constant 0 : i32
    return %c0_i32, %c0_i32_0 : i32, i32
  }
  func.func @transform_13(%arg0: i32) -> i32 {
    %c0_i32 = arith.constant 0 : i32
    %c0_i32_0 = arith.constant 0 : i32
    return %c0_i32 : i32
  }
  func.func @transform_14(%arg0: i32) -> (i32, i32) {
    %c0_i32 = arith.constant 0 : i32
    %c0_i32_0 = arith.constant 0 : i32
    return %arg0, %c0_i32 : i32, i32
  }
}

module attributes {stable_mosaic.version = 11 : i64} {
  func.func @write_unit_kernel(%arg0: i32, %arg1: memref<8x128xf32, #tpu.memory_space<vmem>>, %arg2: memref<8x128xf32, #tpu.memory_space<vmem>>, %arg3: memref<8x128xf32, #tpu.memory_space<vmem>>, %arg4: memref<3x8x128xbf16, #tpu.memory_space<vmem>>, %arg5: memref<3x8x128xbf16, #tpu.memory_space<vmem>>, %arg6: memref<128x128xbf16, #tpu.memory_space<vmem>>, %arg7: memref<128x128xbf16, #tpu.memory_space<vmem>>, %arg8: memref<1x128xf32, #tpu.memory_space<vmem>>, %arg9: memref<1x128xf32, #tpu.memory_space<vmem>>, %arg10: memref<1xf32, #tpu.memory_space<smem>>, %arg11: memref<128x128xbf16, #tpu.memory_space<vmem>>, %arg12: memref<1x128xf32, #tpu.memory_space<vmem>>, %arg13: memref<1x128xf32, #tpu.memory_space<vmem>>, %arg14: memref<1xf32, #tpu.memory_space<smem>>, %arg15: memref<8x128xf32, #tpu.memory_space<vmem>>) attributes {dimension_semantics = [#tpu.dimension_semantics<parallel>], iteration_bounds = array<i64: 2>, scalar_prefetch = 0 : i64, scratch_operands = 0 : i64, tpu.core_type = #tpu.core_type<tc>, window_params = [{transform_indices = @transform_0, window_bounds = array<i64: 8, 128>}, {transform_indices = @transform_1, window_bounds = array<i64: 8, 128>}, {transform_indices = @transform_2, window_bounds = array<i64: 8, 128>}, {transform_indices = @transform_3, window_bounds = array<i64: 3, 8, 128>}, {transform_indices = @transform_4, window_bounds = array<i64: 3, 8, 128>}, {pipeline_mode = #tpu.pipeline_mode<synchronous>, transform_indices = @transform_5, window_bounds = array<i64: 128, 128>}, {pipeline_mode = #tpu.pipeline_mode<synchronous>, transform_indices = @transform_6, window_bounds = array<i64: 128, 128>}, {pipeline_mode = #tpu.pipeline_mode<synchronous>, transform_indices = @transform_7, window_bounds = array<i64: 1, 128>}, {pipeline_mode = #tpu.pipeline_mode<synchronous>, transform_indices = @transform_8, window_bounds = array<i64: 1, 128>}, {transform_indices = @transform_9, window_bounds = array<i64: 1>}, {pipeline_mode = #tpu.pipeline_mode<synchronous>, transform_indices = @transform_10, window_bounds = array<i64: 128, 128>}, {pipeline_mode = #tpu.pipeline_mode<synchronous>, transform_indices = @transform_11, window_bounds = array<i64: 1, 128>}, {pipeline_mode = #tpu.pipeline_mode<synchronous>, transform_indices = @transform_12, window_bounds = array<i64: 1, 128>}, {transform_indices = @transform_13, window_bounds = array<i64: 1>}, {transform_indices = @transform_14, window_bounds = array<i64: 8, 128>}]} {
    %c0 = arith.constant 0 : index
    %c0_0 = arith.constant 0 : index
    %0 = vector.load %arg1[%c0, %c0_0] : memref<8x128xf32, #tpu.memory_space<vmem>>, vector<8x128xf32>
    %c0_1 = arith.constant 0 : index
    %c0_2 = arith.constant 0 : index
    %1 = vector.load %arg2[%c0_1, %c0_2] : memref<8x128xf32, #tpu.memory_space<vmem>>, vector<8x128xf32>
    %c0_3 = arith.constant 0 : index
    %c0_4 = arith.constant 0 : index
    %2 = vector.load %arg3[%c0_3, %c0_4] : memref<8x128xf32, #tpu.memory_space<vmem>>, vector<8x128xf32>
    %3 = arith.truncf %0 : vector<8x128xf32> to vector<8x128xbf16>
    %c0_5 = arith.constant 0 : index
    %c0_6 = arith.constant 0 : index
    %4 = vector.load %arg6[%c0_5, %c0_6] : memref<128x128xbf16, #tpu.memory_space<vmem>>, vector<128x128xbf16>
    %cst = arith.constant dense<0.000000e+00> : vector<8x128xf32>
    %5 = tpu.matmul %3, %4, %cst {dimension_numbers = #tpu.dot_dimension_numbers<[1], [0], [0], [1], [0, 0, 1, 1], [], []>} : vector<8x128xbf16>, vector<128x128xbf16>, vector<8x128xf32> -> vector<8x128xf32>
    %6 = arith.truncf %2 : vector<8x128xf32> to vector<8x128xbf16>
    %c0_7 = arith.constant 0 : index
    %c0_8 = arith.constant 0 : index
    %7 = vector.load %arg7[%c0_7, %c0_8] : memref<128x128xbf16, #tpu.memory_space<vmem>>, vector<128x128xbf16>
    %cst_9 = arith.constant dense<0.000000e+00> : vector<8x128xf32>
    %8 = tpu.matmul %6, %7, %cst_9 {dimension_numbers = #tpu.dot_dimension_numbers<[1], [0], [0], [1], [0, 0, 1, 1], [], []>} : vector<8x128xbf16>, vector<128x128xbf16>, vector<8x128xf32> -> vector<8x128xf32>
    %9 = arith.addf %5, %8 : vector<8x128xf32>
    %c0_10 = arith.constant 0 : index
    %c0_11 = arith.constant 0 : index
    %10 = vector.load %arg8[%c0_10, %c0_11] : memref<1x128xf32, #tpu.memory_space<vmem>>, vector<1x128xf32>
    %11 = vector.broadcast %10 : vector<1x128xf32> to vector<8x128xf32>
    %12 = arith.addf %9, %11 : vector<8x128xf32>
    %c0_12 = arith.constant 0 : index
    %c0_13 = arith.constant 0 : index
    %13 = vector.load %arg9[%c0_12, %c0_13] : memref<1x128xf32, #tpu.memory_space<vmem>>, vector<1x128xf32>
    %14 = vector.broadcast %13 : vector<1x128xf32> to vector<8x128xf32>
    %15 = arith.mulf %1, %14 : vector<8x128xf32>
    %c0_14 = arith.constant 0 : index
    %16 = memref.load %arg10[%c0_14] : memref<1xf32, #tpu.memory_space<smem>>
    %c0_15 = arith.constant 0 : index
    %c0_16 = arith.constant 0 : index
    %c0_17 = arith.constant 0 : index
    %17 = vector.load %arg4[%c0_15, %c0_16, %c0_17] : memref<3x8x128xbf16, #tpu.memory_space<vmem>>, vector<1x8x128xbf16>
    %18 = vector.shape_cast %17 : vector<1x8x128xbf16> to vector<8x128xbf16>
    %19 = arith.extf %18 : vector<8x128xbf16> to vector<8x128xf32>
    %20 = arith.mulf %15, %19 : vector<8x128xf32>
    %cst_18 = arith.constant dense<0.000000e+00> : vector<8xf32>
    %21 = vector.multi_reduction <add>, %20, %cst_18 [1] : vector<8x128xf32> to vector<8xf32>
    %22 = vector.shape_cast %21 : vector<8xf32> to vector<8x1xf32>
    %23 = vector.broadcast %16 : f32 to vector<8x1xf32>
    %24 = arith.addf %22, %23 : vector<8x1xf32>
    %c1 = arith.constant 1 : index
    %c0_19 = arith.constant 0 : index
    %c0_20 = arith.constant 0 : index
    %25 = vector.load %arg4[%c1, %c0_19, %c0_20] : memref<3x8x128xbf16, #tpu.memory_space<vmem>>, vector<1x8x128xbf16>
    %26 = vector.shape_cast %25 : vector<1x8x128xbf16> to vector<8x128xbf16>
    %27 = arith.extf %26 : vector<8x128xbf16> to vector<8x128xf32>
    %28 = arith.mulf %15, %27 : vector<8x128xf32>
    %cst_21 = arith.constant dense<0.000000e+00> : vector<8xf32>
    %29 = vector.multi_reduction <add>, %28, %cst_21 [1] : vector<8x128xf32> to vector<8xf32>
    %30 = vector.shape_cast %29 : vector<8xf32> to vector<8x1xf32>
    %31 = vector.broadcast %16 : f32 to vector<8x1xf32>
    %32 = arith.addf %30, %31 : vector<8x1xf32>
    %c2 = arith.constant 2 : index
    %c0_22 = arith.constant 0 : index
    %c0_23 = arith.constant 0 : index
    %33 = vector.load %arg4[%c2, %c0_22, %c0_23] : memref<3x8x128xbf16, #tpu.memory_space<vmem>>, vector<1x8x128xbf16>
    %34 = vector.shape_cast %33 : vector<1x8x128xbf16> to vector<8x128xbf16>
    %35 = arith.extf %34 : vector<8x128xbf16> to vector<8x128xf32>
    %36 = arith.mulf %15, %35 : vector<8x128xf32>
    %cst_24 = arith.constant dense<0.000000e+00> : vector<8xf32>
    %37 = vector.multi_reduction <add>, %36, %cst_24 [1] : vector<8x128xf32> to vector<8xf32>
    %38 = vector.shape_cast %37 : vector<8xf32> to vector<8x1xf32>
    %39 = vector.broadcast %16 : f32 to vector<8x1xf32>
    %40 = arith.addf %38, %39 : vector<8x1xf32>
    %41 = arith.maximumf %24, %32 : vector<8x1xf32>
    %42 = arith.maximumf %41, %40 : vector<8x1xf32>
    %43 = arith.subf %24, %42 : vector<8x1xf32>
    %44 = math.exp %43 : vector<8x1xf32>
    %45 = arith.subf %32, %42 : vector<8x1xf32>
    %46 = math.exp %45 : vector<8x1xf32>
    %47 = arith.subf %40, %42 : vector<8x1xf32>
    %48 = math.exp %47 : vector<8x1xf32>
    %49 = arith.addf %44, %46 : vector<8x1xf32>
    %50 = arith.addf %49, %48 : vector<8x1xf32>
    %cst_25 = arith.constant 1.000000e+00 : f32
    %51 = vector.broadcast %cst_25 : f32 to vector<8x1xf32>
    %52 = arith.divf %51, %50 : vector<8x1xf32>
    %53 = arith.mulf %44, %52 : vector<8x1xf32>
    %c0_26 = arith.constant 0 : index
    %c0_27 = arith.constant 0 : index
    %c0_28 = arith.constant 0 : index
    %54 = vector.load %arg5[%c0_26, %c0_27, %c0_28] : memref<3x8x128xbf16, #tpu.memory_space<vmem>>, vector<1x8x128xbf16>
    %55 = vector.shape_cast %54 : vector<1x8x128xbf16> to vector<8x128xbf16>
    %56 = arith.extf %55 : vector<8x128xbf16> to vector<8x128xf32>
    %57 = vector.broadcast %53 : vector<8x1xf32> to vector<8x128xf32>
    %58 = arith.mulf %57, %56 : vector<8x128xf32>
    %59 = arith.mulf %46, %52 : vector<8x1xf32>
    %c1_29 = arith.constant 1 : index
    %c0_30 = arith.constant 0 : index
    %c0_31 = arith.constant 0 : index
    %60 = vector.load %arg5[%c1_29, %c0_30, %c0_31] : memref<3x8x128xbf16, #tpu.memory_space<vmem>>, vector<1x8x128xbf16>
    %61 = vector.shape_cast %60 : vector<1x8x128xbf16> to vector<8x128xbf16>
    %62 = arith.extf %61 : vector<8x128xbf16> to vector<8x128xf32>
    %63 = vector.broadcast %59 : vector<8x1xf32> to vector<8x128xf32>
    %64 = arith.mulf %63, %62 : vector<8x128xf32>
    %65 = arith.addf %58, %64 : vector<8x128xf32>
    %66 = arith.mulf %48, %52 : vector<8x1xf32>
    %c2_32 = arith.constant 2 : index
    %c0_33 = arith.constant 0 : index
    %c0_34 = arith.constant 0 : index
    %67 = vector.load %arg5[%c2_32, %c0_33, %c0_34] : memref<3x8x128xbf16, #tpu.memory_space<vmem>>, vector<1x8x128xbf16>
    %68 = vector.shape_cast %67 : vector<1x8x128xbf16> to vector<8x128xbf16>
    %69 = arith.extf %68 : vector<8x128xbf16> to vector<8x128xf32>
    %70 = vector.broadcast %66 : vector<8x1xf32> to vector<8x128xf32>
    %71 = arith.mulf %70, %69 : vector<8x128xf32>
    %72 = arith.addf %65, %71 : vector<8x128xf32>
    %73 = arith.truncf %72 : vector<8x128xf32> to vector<8x128xbf16>
    %c0_35 = arith.constant 0 : index
    %c0_36 = arith.constant 0 : index
    %74 = vector.load %arg11[%c0_35, %c0_36] : memref<128x128xbf16, #tpu.memory_space<vmem>>, vector<128x128xbf16>
    %cst_37 = arith.constant dense<0.000000e+00> : vector<8x128xf32>
    %75 = tpu.matmul %73, %74, %cst_37 {dimension_numbers = #tpu.dot_dimension_numbers<[1], [0], [0], [1], [0, 0, 1, 1], [], []>} : vector<8x128xbf16>, vector<128x128xbf16>, vector<8x128xf32> -> vector<8x128xf32>
    %c0_38 = arith.constant 0 : index
    %c0_39 = arith.constant 0 : index
    %76 = vector.load %arg12[%c0_38, %c0_39] : memref<1x128xf32, #tpu.memory_space<vmem>>, vector<1x128xf32>
    %77 = vector.broadcast %76 : vector<1x128xf32> to vector<8x128xf32>
    %78 = arith.addf %75, %77 : vector<8x128xf32>
    %79 = arith.addf %78, %12 : vector<8x128xf32>
    %c0_40 = arith.constant 0 : index
    %c0_41 = arith.constant 0 : index
    %80 = vector.load %arg13[%c0_40, %c0_41] : memref<1x128xf32, #tpu.memory_space<vmem>>, vector<1x128xf32>
    %81 = vector.broadcast %80 : vector<1x128xf32> to vector<8x128xf32>
    %82 = arith.mulf %1, %81 : vector<8x128xf32>
    %cst_42 = arith.constant dense<0.000000e+00> : vector<8xf32>
    %83 = vector.multi_reduction <add>, %82, %cst_42 [1] : vector<8x128xf32> to vector<8xf32>
    %84 = vector.shape_cast %83 : vector<8xf32> to vector<8x1xf32>
    %c0_43 = arith.constant 0 : index
    %85 = memref.load %arg14[%c0_43] : memref<1xf32, #tpu.memory_space<smem>>
    %86 = vector.broadcast %85 : f32 to vector<8x1xf32>
    %87 = arith.addf %84, %86 : vector<8x1xf32>
    %88 = arith.negf %87 : vector<8x1xf32>
    %89 = math.exp %88 : vector<8x1xf32>
    %cst_44 = arith.constant 1.000000e+00 : f32
    %90 = vector.broadcast %cst_44 : f32 to vector<8x1xf32>
    %91 = arith.addf %90, %89 : vector<8x1xf32>
    %92 = arith.divf %90, %91 : vector<8x1xf32>
    %93 = arith.subf %2, %79 : vector<8x128xf32>
    %94 = vector.broadcast %92 : vector<8x1xf32> to vector<8x128xf32>
    %95 = arith.mulf %94, %93 : vector<8x128xf32>
    %96 = arith.addf %79, %95 : vector<8x128xf32>
    %c0_45 = arith.constant 0 : index
    %c0_46 = arith.constant 0 : index
    %97 = vector.load %arg15[%c0_45, %c0_46] : memref<8x128xf32, #tpu.memory_space<vmem>>, vector<8x128xf32>
    tpu.vector_store %arg15[%c0_45, %c0_46], %96 {strides = array<i32>} : memref<8x128xf32, #tpu.memory_space<vmem>>, vector<8x128xf32>,
    return
  }
  func.func @transform_0(%arg0: i32) -> (i32, i32) {
    %c0_i32 = arith.constant 0 : i32
    %c0_i32_0 = arith.constant 0 : i32
    return %arg0, %c0_i32 : i32, i32
  }
  func.func @transform_1(%arg0: i32) -> (i32, i32) {
    %c0_i32 = arith.constant 0 : i32
    %c0_i32_0 = arith.constant 0 : i32
    return %arg0, %c0_i32 : i32, i32
  }
  func.func @transform_2(%arg0: i32) -> (i32, i32) {
    %c0_i32 = arith.constant 0 : i32
    %c0_i32_0 = arith.constant 0 : i32
    return %arg0, %c0_i32 : i32, i32
  }
  func.func @transform_3(%arg0: i32) -> (i32, i32, i32) {
    %c0_i32 = arith.constant 0 : i32
    %c0_i32_0 = arith.constant 0 : i32
    %c0_i32_1 = arith.constant 0 : i32
    return %c0_i32, %arg0, %c0_i32_0 : i32, i32, i32
  }
  func.func @transform_4(%arg0: i32) -> (i32, i32, i32) {
    %c0_i32 = arith.constant 0 : i32
    %c0_i32_0 = arith.constant 0 : i32
    %c0_i32_1 = arith.constant 0 : i32
    return %c0_i32, %arg0, %c0_i32_0 : i32, i32, i32
  }
  func.func @transform_5(%arg0: i32) -> (i32, i32) {
    %c0_i32 = arith.constant 0 : i32
    %c0_i32_0 = arith.constant 0 : i32
    %c0_i32_1 = arith.constant 0 : i32
    return %c0_i32, %c0_i32_0 : i32, i32
  }
  func.func @transform_6(%arg0: i32) -> (i32, i32) {
    %c0_i32 = arith.constant 0 : i32
    %c0_i32_0 = arith.constant 0 : i32
    %c0_i32_1 = arith.constant 0 : i32
    return %c0_i32, %c0_i32_0 : i32, i32
  }
  func.func @transform_7(%arg0: i32) -> (i32, i32) {
    %c0_i32 = arith.constant 0 : i32
    %c0_i32_0 = arith.constant 0 : i32
    %c0_i32_1 = arith.constant 0 : i32
    return %c0_i32, %c0_i32_0 : i32, i32
  }
  func.func @transform_8(%arg0: i32) -> (i32, i32) {
    %c0_i32 = arith.constant 0 : i32
    %c0_i32_0 = arith.constant 0 : i32
    %c0_i32_1 = arith.constant 0 : i32
    return %c0_i32, %c0_i32_0 : i32, i32
  }
  func.func @transform_9(%arg0: i32) -> i32 {
    %c0_i32 = arith.constant 0 : i32
    %c0_i32_0 = arith.constant 0 : i32
    return %c0_i32 : i32
  }
  func.func @transform_10(%arg0: i32) -> (i32, i32) {
    %c0_i32 = arith.constant 0 : i32
    %c0_i32_0 = arith.constant 0 : i32
    %c0_i32_1 = arith.constant 0 : i32
    return %c0_i32, %c0_i32_0 : i32, i32
  }
  func.func @transform_11(%arg0: i32) -> (i32, i32) {
    %c0_i32 = arith.constant 0 : i32
    %c0_i32_0 = arith.constant 0 : i32
    %c0_i32_1 = arith.constant 0 : i32
    return %c0_i32, %c0_i32_0 : i32, i32
  }
  func.func @transform_12(%arg0: i32) -> (i32, i32) {
    %c0_i32 = arith.constant 0 : i32
    %c0_i32_0 = arith.constant 0 : i32
    %c0_i32_1 = arith.constant 0 : i32
    return %c0_i32, %c0_i32_0 : i32, i32
  }
  func.func @transform_13(%arg0: i32) -> i32 {
    %c0_i32 = arith.constant 0 : i32
    %c0_i32_0 = arith.constant 0 : i32
    return %c0_i32 : i32
  }
  func.func @transform_14(%arg0: i32) -> (i32, i32) {
    %c0_i32 = arith.constant 0 : i32
    %c0_i32_0 = arith.constant 0 : i32
    return %arg0, %c0_i32 : i32, i32
  }
}

</mosaic_0001>

<bundles_post_ra>
// kernel: _write_unit_impl.1
= control target key start
LH: loop header
LB: loop body
LE: loop exit
PB: predicated region body
PF: predicated region fallthrough
CT: control target
= control target key end

     0   :  { %s2399_s0 = inlined_call_operand.vmem [shape: f32[16,128], index: 0, kind: input, shape index: {}]   ;;  %s2400_s1 = inlined_call_operand.hbm [shape: f32[16,128], index: 1, kind: input, shape index: {}]   ;;  %s2401_s2 = inlined_call_operand.hbm [shape: f32[16,128], index: 2, kind: input, shape index: {}]   ;;  %s2402_s3 = inlined_call_operand.hbm [shape: bf16[3,16,128], index: 3, kind: input, shape index: {}]   ;;  %s2403_s4 = inlined_call_operand.hbm [shape: bf16[3,16,128], index: 4, kind: input, shape index: {}]   ;;  %s2404_s5 = inlined_call_operand.hbm [shape: bf16[128,128], index: 5, kind: input, shape index: {}]   ;;  %s2405_s6 = inlined_call_operand.hbm [shape: bf16[128,128], index: 6, kind: input, shape index: {}]   ;;  %s2406_s7 = inlined_call_operand.vmem [shape: f32[1,128], index: 7, kind: input, shape index: {}]   ;;  %s2407_s8 = inlined_call_operand.vmem [shape: f32[1,128], index: 8, kind: input, shape index: {}]   ;;  %s2408_s9 = inlined_call_operand.<no memory space> [shape: f32[1], index: 9, kind: input, shape index: {}]   ;;  %s2409_s10 = inlined_call_operand.hbm [shape: bf16[128,128], index: 10, kind: input, shape index: {}]   ;;  %s2410_s11 = inlined_call_operand.vmem [shape: f32[1,128], index: 11, kind: input, shape index: {}]   ;;  %s2411_s12 = inlined_call_operand.vmem [shape: f32[1,128], index: 12, kind: input, shape index: {}]   ;;  %s2412_s13 = inlined_call_operand.<no memory space> [shape: f32[1], index: 13, kind: input, shape index: {}]   ;;  %s2413_s14 = inlined_call_operand.hbm [shape: f32[16,128], index: 14, kind: output, shape index: {}]  }
   0x1   :  { %2438 = sst [smem:[#allocation29_spill]] %s2401_s2 }
   0x2   :  { %2439 = sst [smem:[#allocation30_spill]] %s2404_s5 }
   0x3   :  { %2440 = sst [smem:[#allocation31_spill]] %s2405_s6 }
   0x4   :  { %2441 = sst [smem:[#allocation32_spill]] %s2406_s7 }
   0x5   :  { %2442 = sst [smem:[#allocation33_spill]] %s2409_s10 }
   0x6   :  { %2443 = sst [smem:[#allocation34_spill]] %s2410_s11 }
   0x7   :  { %2444 = sst [smem:[#allocation35_spill]] %s2411_s12 }
   0x8   :  { %2445 = sst [smem:[#allocation36_spill]] %s2413_s14 }
   0x9   :  { %19 = sst [smem:[#allocation2]] %s2408_s9 }
   0xa   :  { %20 = sst [smem:[#allocation3]] %s2412_s13 }
   0xb   :  { %21 = vsyncpa [#allocation5], 0 }
   0xc   :  { %23 = vsyncpa [#allocation5 + $0x1], 0 }
   0xd   :  { %24 = vsyncpa [#allocation8], 0 }
   0xe   :  { %26 = vsyncpa [#allocation8 + $0x1], 0 }
   0xf   :  { %27 = vsyncpa [#allocation11], 0 }
  0x10   :  { %29 = vsyncpa [#allocation11 + $0x1], 0 }
  0x11   :  { %30 = vsyncpa [#allocation14], 0 }
  0x12   :  { %31 = vsyncpa [#allocation6], 0 }
  0x13   :  { %33 = vsyncpa [#allocation6 + $0x1], 0  ;;  %s1939_s17 = smov 0   ;;  %s1941_s18 = smov 0  }
  0x14   :  { %s1943_s19 = smov 0   ;;  %s1945_s9 = smov 0  }
  0x15 LB: > { %2446 = sst [smem:[#allocation23_spill]] %s1831_s17  ;;  %s1960_s13 = sadd.s32 4294967295, %s1843_s9   ;;  %s1843_s9 = sphi %s1945_s9, %s2491_s9   ;;  %s1839_s19 = sphi %s1943_s19, %s2493_s19   ;;  %s1835_s18 = sphi %s1941_s18, %s2495_s18   ;;  %s1831_s17 = sphi %s1939_s17, %s2494_s17  }
  0x16   : > { %2447 = sst [smem:[#allocation24_spill]] %s1839_s19  ;;  %s1266_s20 = sadd.s32 4294967294, %s1843_s9  }
  0x17   : > { %p85_p0 = scmp.ne.s32.totalorder %s1835_s18, %s1831_s17  ;;  %p2415_p1 = scmp.eq.s32.totalorder %s1960_s13, 0 }
  0x18   : > { %p382_p3 = scmp.eq.s32.totalorder %s1266_s20, 1  ;;  %p1267_p5 = scmp.ge.s32.totalorder %s1843_s9, 1 }
  0x19   : > { %p1969_p4 = por %p2415_p1, %p85_p0  ;;  %p389_p7 = scmp.lt.s32.totalorder %s1843_s9, 3 }
  0x1a   : > { %p1974_p6 = por %p382_p3, %p85_p0  ;;  %s1845_s24 = smov [#allocation12]  }
  0x1b   : > { %s2448_s21 = scalar_select %p1969_p4, 1, 0 }
  0x1c   : > { %s2449_s22 = scalar_select %p1974_p6, 1, 0 }
  0x1d   : > { %p1979_p8 = pnand %p1267_p5, %p389_p7  ;;  %s401_s25 = sshll.u32 %s1845_s24, 4  ;;  %s1983_s25 = int_to_ptr.vmem [resolvable:$true] %s401_s25 }
  0x1e   : > { %2450 = sst [smem:[#allocation25_spill]] %s2449_s22  ;;  %s1846_s27 = smov [#allocation13]  }
  0x1f   : > { %s2451_s23 = scalar_select %p1979_p8, 1, 0 }
  0x20   : > { %p1446_p9 = pneg %p1979_p8  ;;  %s414_s28 = sshll.u32 %s1846_s27, 4  ;;  %s1994_s28 = int_to_ptr.vmem [resolvable:$true] %s414_s28 }
  0x21   : > { %s2453_s5 = sld [smem:[#allocation30_spill]] }
  0x22   : > { %p1990_p11 = pnand %p1446_p9, %p2415_p1 }
  0x24   : > { %s2452_s26 = scalar_select %p1990_p11, 1, 0 }
  0x25   : > { %p2004_p13 = pneg %p1990_p11 }
  0x27   : > { %s1557_s15 = scalar_lea.hbm %s2453_s5, 1024 }
  0x28   : > { %p1558_p12 = scmp.ne.s32.totalorder %s2453_s5, %s1557_s15  ;;  %p1564_p5 = scmp.lt.u32.totalorder %s1557_s15, %s2453_s5 }
  0x29   : > { %s2454_s24 = scalar_select %p2004_p13, 1, 0 }
  0x2a   : > { %p1560_p0 = pnand %p2004_p13, %p1558_p12 }
  0x2c   : > { %p1561_p3 = pneg %p1560_p0 }
  0x2e   : > { %p1566_p7 = pnand %p1564_p5, %p1561_p3 }
  0x30   : > { %1569 = shalt.err (!%p1566_p7)
}
  0x31   : > { %s1570_s29 = scalar_lea.vmem %s1983_s25, 1024  ;;  %p1578_p2 = scmp.lt.s32.totalorder %s1983_s25, %s1983_s25 }
  0x32   : > { %p1571_p9 = scmp.ne.s32.totalorder %s1983_s25, %s1570_s29  ;;  %p1579_p6 = scmp.lt.s32.totalorder %s1570_s29, %s1570_s29 }
  0x34   : > { %p1573_p10 = pnand %p1571_p9, %p2004_p13  ;;  %p1580_p12 = por %p1579_p6, %p1578_p2 }
  0x36   : > { %p1574_p1 = pneg %p1573_p10 }
  0x38   : > { %p1581_p0 = pnand %p1580_p12, %p1574_p1 }
  0x3a   : > { %1584 = shalt.err (!%p1581_p0)
}
  0x3b   : > { %s2418_s30 = smov 64   ;;  %s2420_s22 = smov 4  }
  0x3c   : > { %1449 = dma.hbm_to_vmem [thread:$0]  (!%p1990_p11), %s2453_s5, 1024, %s1983_s25, [#allocation11], %s2418_s30, %s2418_s30, %s2420_s22  }
  0x3d   : > { %s2455_s6 = sld [smem:[#allocation31_spill]] }
  0x43   : > { %s1585_s29 = scalar_lea.hbm %s2455_s6, 1024 }
  0x44   : > { %p1586_p1 = scmp.ne.s32.totalorder %s2455_s6, %s1585_s29  ;;  %p1592_p10 = scmp.lt.u32.totalorder %s1585_s29, %s2455_s6 }
  0x46   : > { %p1588_p2 = pnand %p1586_p1, %p2004_p13 }
  0x48   : > { %p1589_p6 = pneg %p1588_p2 }
  0x4a   : > { %p1594_p3 = pnand %p1592_p10, %p1589_p6 }
  0x4c   : > { %1597 = shalt.err (!%p1594_p3)
}
  0x4d   : > { %s1598_s25 = scalar_lea.vmem %s1994_s28, 1024  ;;  %p1606_p12 = scmp.lt.s32.totalorder %s1994_s28, %s1994_s28 }
  0x4e   : > { %p1599_p5 = scmp.ne.s32.totalorder %s1994_s28, %s1598_s25  ;;  %p1607_p0 = scmp.lt.s32.totalorder %s1598_s25, %s1598_s25 }
  0x50   : > { %p1601_p7 = pnand %p1599_p5, %p2004_p13  ;;  %p1608_p1 = por %p1607_p0, %p1606_p12 }
  0x52   : > { %p1602_p9 = pneg %p1601_p7 }
  0x54   : > { %p1609_p2 = pnand %p1608_p1, %p1602_p9 }
  0x56   : > { %1612 = shalt.err (!%p1609_p2)
}
  0x57   : > { %1452 = dma.hbm_to_vmem [thread:$0]  (!%p1990_p11), %s2455_s6, 1024, %s1994_s28, [#allocation14], %s2418_s30, %s2418_s30, %s2420_s22  }
  0x58   : > { %s2055_s14 = sadd.s32 1, %s1843_s9   ;;  %s72_s17 = sadd.s32 1, %s1839_s19 }
  0x59   : > { %2456 = sst [smem:[#allocation26_spill]] %s2055_s14  ;;  %s69_s15 = ssub.s32 %s1843_s9, %s2055_s14 }
  0x5a   : > { %p79_p6 = scmp.ne.s32.totalorder %s1839_s19, %s1835_s18  ;;  %p70_p10 = scmp.eq.s32.totalorder %s69_s15, 0 }
  0x5b   : > { %p80_p3 = scmp.eq.s32.totalorder %s1843_s9, 0  ;;  %p2457_p5 = scmp.eq.s32.totalorder %s1960_s13, 1 }
  0x5c   : > { %p1476_p9 = scmp.lt.s32.totalorder %s1843_s9, 2  ;;  %s2074_s28 = sand.u32 1, %s1839_s19  }
  0x5d   : > { %p2065_p7 = por %p2457_p5, %p79_p6  ;;  %p81_p12 = por %p80_p3, %p79_p6 }
  0x5e   : > { %s2071_s20 = scalar_select %p70_p10, %s1839_s19, %s72_s17  }
  0x5f   : > { %s2458_s16 = scalar_select %p2065_p7, 1, 0 }
  0x60   : > { %2460 = sst [smem:[#allocation28_spill]] %s2071_s20  ;;  %s2422_s27 = sshll.u32 %s2074_s28, 3 }
  0x61   : > { %2459 = sst [smem:[#allocation27_spill]] %s2458_s16  ;;  %s2423_s29 = sshll.u32 %s1843_s9, 7 }
  0x62   : > { %p2078_p0 = pnand %p1476_p9, %p81_p12  ;;  %s2426_s7 = sand.u32 1, %s1843_s9  }
  0x63   : > { %s2462_s2 = sld [smem:[#allocation29_spill]]  ;;  %s488_s30 = scalar_lea.vmem [#allocation7], %s2422_s27 }
  0x64   : > { %s2461_s25 = scalar_select %p2078_p0, 1, 0 }
  0x65   : > { %s495_s22 = sshll.u32 %s488_s30, 4  ;;  %s2097_s6 = scalar_lea.sflag [#allocation8], %s2426_s7  ;;  %s2093_s22 = int_to_ptr.vmem [resolvable:$true] %s495_s22 }
  0x66   : > { %p2103_p2 = pneg %p2078_p0 }
  0x69   : > { %s2088_s17 = scalar_lea.hbm %s2462_s2, %s2423_s29  ;;  %s1618_s30 = scalar_lea.hbm %s2462_s2, 256 }
  0x6a   : > { %s1613_s20 = scalar_lea.hbm %s2088_s17, 128  ;;  %p1619_p3 = scmp.lt.u32.totalorder %s2088_s17, %s2462_s2 }
  0x6b   : > { %p1614_p1 = scmp.ne.s32.totalorder %s2088_s17, %s1613_s20  ;;  %p1620_p5 = scmp.lt.u32.totalorder %s1618_s30, %s1613_s20 }
  0x6c   : > { %p1622_p12 = scmp.lt.u32.totalorder %s1613_s20, %s2088_s17 }
  0x6d   : > { %p1616_p6 = pnand %p2103_p2, %p1614_p1  ;;  %p1621_p9 = por %p1620_p5, %p1619_p3 }
  0x6f   : > { %p1617_p10 = pneg %p1616_p6  ;;  %p1623_p7 = por %p1622_p12, %p1621_p9 }
  0x71   : > { %p1624_p4 = pnand %p1623_p7, %p1617_p10 }
  0x73   : > { %1627 = shalt.err (!%p1624_p4)
}
  0x74   : > { %s1628_s7 = scalar_lea.vmem %s2093_s22, 128  ;;  %s1849_s27 = smov [#allocation7]  }
  0x75   : > { %p1629_p1 = scmp.ne.s32.totalorder %s2093_s22, %s1628_s7  ;;  %s1633_s15 = sshll.u32 %s1849_s27, 4  ;;  %s1634_s15 = int_to_ptr.vmem [resolvable:$false] %s1633_s15 }
  0x76   : > { %s1635_s5 = scalar_lea.vmem %s1634_s15, 256  ;;  %p1636_p11 = scmp.lt.s32.totalorder %s2093_s22, %s1634_s15 }
  0x77   : > { %p1631_p6 = pnand %p1629_p1, %p2103_p2  ;;  %p1637_p13 = scmp.lt.s32.totalorder %s1635_s5, %s1628_s7 }
  0x79   : > { %p1632_p8 = pneg %p1631_p6  ;;  %p1638_p3 = por %p1637_p13, %p1636_p11 }
  0x7b   : > { %p1639_p5 = pnand %p1638_p3, %p1632_p8 }
  0x7d   : > { %1642 = shalt.err (!%p1639_p5)
}
  0x7e   : > { %1462 = dma.hbm_to_vmem [thread:$0]  (!%p2078_p0), %s2088_s17, 128, %s2093_s22, %s2097_s6  }
  0x7f   : > { %s2464_s20 = smul.u32 12, %s2074_s28  ;;  %s1850_s7 = smov [#allocation15]  }
  0x80   : > { %s436_s5 = sshll.u32 %s1850_s7, 4  ;;  %s2466_s19 = sshll.u32 %s1843_s9, 7  ;;  %s437_s5 = int_to_ptr.vmem [resolvable:$true] %s436_s5 }
  0x81   : > { %s506_s29 = scalar_lea.vmem [#allocation9], %s2464_s20  ;;  %s2465_s27 = smov %s2464_s20 }
  0x82   : > { %s512_s30 = sshll.u32 %s506_s29, 4  ;;  %s526_s2 = scalar_lea.vmem [#allocation10], %s2465_s27  ;;  %s2131_s30 = int_to_ptr.vmem [resolvable:$true] %s512_s30 }
  0x83   : > { %s532_s15 = sshll.u32 %s526_s2, 4  ;;  %s2140_s12 = scalar_lea.hbm %s2400_s1, %s2466_s19  ;;  %s2133_s15 = int_to_ptr.vmem [resolvable:$true] %s532_s15 }
  0x84   : > { %s2467_s10 = sld [smem:[#allocation33_spill]]  ;;  %p2468_p8 = scmp.ne.s32.totalorder %s2454_s24, 0 }
  0x8a   : > { %s1643_s20 = scalar_lea.hbm %s2467_s10, 1024 }
  0x8b   : > { %p1644_p4 = scmp.ne.s32.totalorder %s2467_s10, %s1643_s20  ;;  %p1650_p7 = scmp.lt.u32.totalorder %s1643_s20, %s2467_s10 }
  0x8d   : > { %p1646_p11 = pnand %p1644_p4, %p2468_p8 }
  0x8f   : > { %p1647_p13 = pneg %p1646_p11 }
  0x91   : > { %p1652_p10 = pnand %p1650_p7, %p1647_p13 }
  0x93   : > { %1655 = shalt.err (!%p1652_p10)
}
  0x94   : > { %s1656_s14 = scalar_lea.vmem %s437_s5, 1024  ;;  %p1664_p6 = scmp.lt.s32.totalorder %s437_s5, %s437_s5 }
  0x95   : > { %p1657_p9 = scmp.ne.s32.totalorder %s437_s5, %s1656_s14  ;;  %p1665_p3 = scmp.lt.s32.totalorder %s1656_s14, %s1656_s14 }
  0x97   : > { %p1659_p12 = pnand %p1657_p9, %p2468_p8  ;;  %p1666_p5 = por %p1665_p3, %p1664_p6 }
  0x99   : > { %p1660_p1 = pneg %p1659_p12 }
  0x9b   : > { %p1667_p0 = pnand %p1666_p5, %p1660_p1 }
  0x9d   : > { %1670 = shalt.err (!%p1667_p0)
}
  0x9e   : > { %p2469_p4 = scmp.ne.s32.totalorder %s2452_s26, 0  ;;  %s2470_s19 = smov 4  }
  0x9f   : > { %s2471_s16 = smov 64   ;;  %s2472_s24 = sshll.u32 %s2074_s28, 3 }
  0xa0   : > { %1455 = dma.hbm_to_vmem [thread:$0]  (!%p2469_p4), %s2467_s10, 1024, %s437_s5, [#allocation14], %s2471_s16, %s2471_s16, %s2470_s19  }
  0xa1   : > { %s470_s20 = scalar_lea.vmem [#allocation4], %s2472_s24  ;;  %s1276_s26 = sshll.u32 %s1843_s9, 6 }
  0xa2   : > { %s477_s29 = sshll.u32 %s470_s20, 4  ;;  %s2173_s7 = scalar_lea.hbm %s2402_s3, %s1276_s26  ;;  %s2166_s29 = int_to_ptr.vmem [resolvable:$true] %s477_s29 }
  0xa3   : > { %s467_s14 = scalar_lea.sflag [#allocation5], %s2074_s28  ;;  %s1671_s22 = scalar_lea.hbm %s2140_s12, 128 }
  0xa4   : > { %p1672_p0 = scmp.ne.s32.totalorder %s2140_s12, %s1671_s22  ;;  %s1676_s24 = scalar_lea.hbm %s2400_s1, 256 }
  0xa5   : > { %p1677_p13 = scmp.lt.u32.totalorder %s2140_s12, %s2400_s1  ;;  %p1678_p7 = scmp.lt.u32.totalorder %s1676_s24, %s1671_s22 }
  0xa6   : > { %p1674_p8 = pnand %p1672_p0, %p2103_p2  ;;  %p1680_p9 = scmp.lt.u32.totalorder %s1671_s22, %s2140_s12 }
  0xa7   : > { %p1679_p10 = por %p1678_p7, %p1677_p13 }
  0xa8   : > { %p1675_p11 = pneg %p1674_p8 }
  0xa9   : > { %p1681_p12 = por %p1680_p9, %p1679_p10 }
  0xab   : > { %p1682_p1 = pnand %p1681_p12, %p1675_p11 }
  0xad   : > { %1685 = shalt.err (!%p1682_p1)
}
  0xae   : > { %s1686_s28 = scalar_lea.vmem %s2166_s29, 128  ;;  %s1851_s27 = smov [#allocation4]  }
  0xaf   : > { %p1687_p6 = scmp.ne.s32.totalorder %s2166_s29, %s1686_s28  ;;  %s1691_s2 = sshll.u32 %s1851_s27, 4  ;;  %s1692_s2 = int_to_ptr.vmem [resolvable:$false] %s1691_s2 }
  0xb0   : > { %s1693_s10 = scalar_lea.vmem %s1692_s2, 256  ;;  %p1694_p4 = scmp.lt.s32.totalorder %s2166_s29, %s1692_s2 }
  0xb1   : > { %p1689_p3 = pnand %p1687_p6, %p2103_p2  ;;  %p1695_p0 = scmp.lt.s32.totalorder %s1693_s10, %s1686_s28 }
  0xb3   : > { %p1690_p5 = pneg %p1689_p3  ;;  %p1696_p8 = por %p1695_p0, %p1694_p4 }
  0xb5   : > { %p1697_p13 = pnand %p1696_p8, %p1690_p5 }
  0xb7   : > { %1700 = shalt.err (!%p1697_p13)
}
  0xb8   : > { %p2473_p11 = scmp.ne.s32.totalorder %s2461_s25, 0  ;;  %s2202_s5 = scalar_lea.hbm %s2403_s4, %s1276_s26 }
  0xb9   : > { %s1701_s24 = scalar_lea.hbm %s2173_s7, 192  ;;  %s1706_s27 = scalar_lea.hbm %s2402_s3, 384 }
  0xba   : > { %1459 = dma.hbm_to_vmem [thread:$0]  (!%p2473_p11), %s2140_s12, 128, %s2166_s29, %s467_s14  }
  0xbb   : > { %p1702_p7 = scmp.ne.s32.totalorder %s2173_s7, %s1701_s24  ;;  %p1707_p12 = scmp.lt.u32.totalorder %s2173_s7, %s2402_s3 }
  0xbc   : > { %p1708_p1 = scmp.lt.u32.totalorder %s1706_s27, %s1701_s24  ;;  %p1710_p3 = scmp.lt.u32.totalorder %s1701_s24, %s2173_s7 }
  0xbd   : > { %p1704_p10 = pnand %p1702_p7, %p2103_p2 }
  0xbe   : > { %p1709_p6 = por %p1708_p1, %p1707_p12 }
  0xbf   : > { %p1705_p9 = pneg %p1704_p10 }
  0xc0   : > { %p1711_p5 = por %p1710_p3, %p1709_p6 }
  0xc2   : > { %p1712_p4 = pnand %p1711_p5, %p1705_p9 }
  0xc4   : > { %1715 = shalt.err (!%p1712_p4)
}
  0xc5   : > { %s1716_s12 = scalar_lea.vmem %s2131_s30, 192  ;;  %s1852_s29 = smov [#allocation9]  }
  0xc6   : > { %p1717_p0 = scmp.ne.s32.totalorder %s2131_s30, %s1716_s12  ;;  %s1721_s26 = sshll.u32 %s1852_s29, 4  ;;  %s1722_s26 = int_to_ptr.vmem [resolvable:$false] %s1721_s26 }
  0xc7   : > { %s1723_s14 = scalar_lea.vmem %s1722_s26, 384  ;;  %p1724_p7 = scmp.lt.s32.totalorder %s2131_s30, %s1722_s26 }
  0xc8   : > { %p1719_p8 = pnand %p1717_p0, %p2103_p2  ;;  %p1725_p10 = scmp.lt.s32.totalorder %s1723_s14, %s1716_s12 }
  0xca   : > { %p1720_p13 = pneg %p1719_p8  ;;  %p1726_p12 = por %p1725_p10, %p1724_p7 }
  0xcc   : > { %p1727_p1 = pnand %p1726_p12, %p1720_p13 }
  0xce   : > { %1730 = shalt.err (!%p1727_p1)
}
  0xcf   : > { %s1853_s22 = smov 128   ;;  %s2474_s17 = sand.u32 1, %s1843_s9  }
  0xd0   : > { %1465 = dma.hbm_to_vmem [thread:$0]  (!%p2473_p11), %s2173_s7, 192, %s2131_s30, %s2097_s6, %s1853_s22, %s2471_s16, %s2470_s19  }
  0xd1   : > { %s2231_s24 = scalar_lea.sflag [#allocation11], %s2474_s17  ;;  %s1731_s20 = scalar_lea.hbm %s2202_s5, 192 }
  0xd2   : > { %p1732_p9 = scmp.ne.s32.totalorder %s2202_s5, %s1731_s20  ;;  %s1736_s2 = scalar_lea.hbm %s2403_s4, 384 }
  0xd3   : > { %p1737_p5 = scmp.lt.u32.totalorder %s2202_s5, %s2403_s4  ;;  %p1738_p4 = scmp.lt.u32.totalorder %s1736_s2, %s1731_s20 }
  0xd4   : > { %p1734_p6 = pnand %p1732_p9, %p2103_p2  ;;  %p1740_p8 = scmp.lt.u32.totalorder %s1731_s20, %s2202_s5 }
  0xd5   : > { %p1739_p0 = por %p1738_p4, %p1737_p5 }
  0xd6   : > { %p1735_p3 = pneg %p1734_p6 }
  0xd7   : > { %p1741_p13 = por %p1740_p8, %p1739_p0 }
  0xd9   : > { %p1742_p7 = pnand %p1741_p13, %p1735_p3 }
  0xdb   : > { %1745 = shalt.err (!%p1742_p7)
}
  0xdc   : > { %s1746_s6 = scalar_lea.vmem %s2133_s15, 192  ;;  %s1854_s30 = smov [#allocation10]  }
  0xdd   : > { %p1747_p10 = scmp.ne.s32.totalorder %s2133_s15, %s1746_s6  ;;  %s1751_s7 = sshll.u32 %s1854_s30, 4  ;;  %s1752_s7 = int_to_ptr.vmem [resolvable:$false] %s1751_s7 }
  0xde   : > { %s1753_s29 = scalar_lea.vmem %s1752_s7, 384  ;;  %p1754_p9 = scmp.lt.s32.totalorder %s2133_s15, %s1752_s7 }
  0xdf   : > { %p1749_p12 = pnand %p1747_p10, %p2103_p2  ;;  %p1755_p6 = scmp.lt.s32.totalorder %s1753_s29, %s1746_s6 }
  0xe1   : > { %p1750_p1 = pneg %p1749_p12  ;;  %p1756_p5 = por %p1755_p6, %p1754_p9 }
  0xe3   : > { %p1757_p4 = pnand %p1756_p5, %p1750_p1 }
  0xe5   : > { %1760 = shalt.err (!%p1757_p4)
}
  0xe6   : > { %1468 = dma.hbm_to_vmem [thread:$0]  (!%p2473_p11), %s2202_s5, 192, %s2133_s15, %s2231_s24, %s1853_s22, %s2471_s16, %s2470_s19  }
  0xe7   : > { %p2475_p2 = scmp.ne.s32.totalorder %s2451_s23, 0 }
  0xe8   : > { %s2261_s11 = sand.u32 (!%p2475_p2), 1, %s1835_s18   ;;  %p2476_p3 = scmp.ne.s32.totalorder (!%p2475_p2), %s2448_s21, 0 }
  0xe9   : > { %544 = sbr.rel (%p2475_p2) target bundleno = 689 (0x2b1), region = 76  ;;  %s2264_s26 = sshll.u32 (!%p2475_p2), %s2261_s11, 3 }
  0xea   : > { %s547_s25 = scalar_lea.sflag (!%p2475_p2), [#allocation5], %s2261_s11  ;;  %s550_s14 = scalar_lea.vmem (!%p2475_p2), [#allocation4], %s2264_s26 }
  0xf0   : > { %1806 = dma.done.wait (%p2476_p3), %s547_s25, 128  }
  0xf1   : > { %1808 = vsyncadd (%p2476_p3), %s547_s25, 4294967168  ;;  %s555_s23 = sand.u32 1, %s1960_s13   ;;  %s559_s19 = scalar_lea.vmem [#allocation7], %s2264_s26 }
  0xf2   : > { %s556_s15 = scalar_lea.sflag [#allocation8], %s555_s23 }
  0xf3   : > { %1810 = dma.done.wait (%p2476_p3), %s556_s15, 320  }
  0xf4   : > { %1812 = vsyncadd (%p2476_p3), %s556_s15, 4294966976  ;;  %s1423_s16 = smul.u32 12, %s2261_s11  ;;  %s574_s22 = scalar_lea.sflag [#allocation11], %s555_s23 }
  0xf6   : > { %s568_s5 = scalar_lea.vmem [#allocation9], %s1423_s16  ;;  %s2279_s17 = scalar_lea.vmem [#allocation10], %s1423_s16 }
  0xf7   : > { %1814 = dma.done.wait (%p2476_p3), %s574_s22, 192  }
  0xf8   : > { %1816 = vsyncadd (%p2476_p3), %s574_s22, 4294967104  ;;  %p2477_p11 = scmp.eq.s32.totalorder %s1960_s13, 0 }
  0xfa   : > { %1818 = dma.done.wait (%p2477_p11), [#allocation11], 1024   ;;  %p2478_p0 = pmov %p2477_p11 }
  0xfc   : > { %1820 = vsyncadd (%p2478_p0), [#allocation11], 4294966272  ;;  %p2479_p8 = pmov %p2478_p0 }
  0xfd   : > { %p2480_p13 = pmov %p2478_p0 }
  0xfe   : > { %1822 = dma.done.wait (%p2479_p8), [#allocation14], 2048  }
  0xff   : > { %1824 = vsyncadd (%p2480_p13), [#allocation14], 4294965248  ;;  %v1855_v0 = vmov 0.0   ;;  %v2295_v1 = vld [vmem:[%s550_s14] sm:$0xff]  ;;  %v1305_v7 = vld [vmem:[%s568_s5 + $0x8] sm:$0xf] }
 0x100   : > { %1374 = vmatprep.subr.bf16.mxu0 %v1855_v0  ;;  %1354 = vmatprep.subr.bf16.mxu1 %v1855_v0  ;;  %v1303_v2 = vld [vmem:[%s2407_s8] ss:$0 sm:$0xff]  ;;  %v904_v8 = vunpack.c.l.bf16 %v1305_v7  ;;  %v1521_v9 = vld [vmem:[#allocation12] sm:$0xff]   ;;  %v1522_v12 = vld [vmem:[#allocation12 + $0x8] sm:$0xff]   ;;  %p653_p7 = scmp.lt.s32.totalorder %s1960_s13, 1  ;;  %vm1856_vm0 = vmmov 0  }
 0x101   : > { %v888_v3 = vld [vmem:[%s568_s5] sm:$0xff]   ;;  %v886_v4 = vmul.f32 %v1303_v2, %v2295_v1  ;;  %1375 = vmatpush3.bf16.msra.mxu0 %v1521_v9  ;;  %v1526_v17 = vld [vmem:[#allocation12 + $0x28] sm:$0xff]   ;;  %1390 = vmatprep.mubr.msk.bf16.mxu0 %vm1856_vm0, %v1855_v0  ;;  %s2481_s30 = sld [smem:[#allocation35_spill]]  ;;  %s887_s7 = sld [smem:[#allocation2]] }
 0x102   : > { %v889_v5 = vunpack.c.l.bf16 %v888_v3  ;;  %v897_v6 = vunpack.c.h.bf16 %v888_v3  ;;  %1376 = vmatprep.subr.bf16.mxu0 %v1855_v0  ;;  %v1523_v14 = vld [vmem:[#allocation12 + $0x10] sm:$0xff]   ;;  %v1524_v15 = vld [vmem:[#allocation12 + $0x18] sm:$0xff]   ;;  %v1525_v16 = vld [vmem:[#allocation12 + $0x20] sm:$0xff]   ;;  %s654_s20 = scalar_select %p653_p7, %s1960_s13, 1  ;;  %1370 = vmatprep.mubr.msk.bf16.mxu1 %vm1856_vm0, %v1855_v0 }
 0x103   : > { %v905_v11 = vmul.f32 %v904_v8, %v886_v4  ;;  %v1527_v18 = vld [vmem:[#allocation12 + $0x30] sm:$0xff]   ;;  %v1528_v19 = vld [vmem:[#allocation13] sm:$0xff]   ;;  %v1529_v20 = vld [vmem:[#allocation12 + $0x38] sm:$0xff]   ;;  %s1063_s29 = sld [smem:[#allocation3]]  ;;  %s2482_s23 = sld [smem:[#allocation32_spill]] }
 0x104   : > { %v890_v10 = vmul.f32 %v889_v5, %v886_v4  ;;  %v898_v13 = vmul.f32 %v897_v6, %v886_v4  ;;  %1355 = vmatpush3.bf16.msra.mxu1 %v1528_v19  ;;  %v1530_v21 = vld [vmem:[#allocation13 + $0x8] sm:$0xff]   ;;  %s1285_s28 = sshll.u32 %s654_s20, 3  ;;  %v1531_v24 = vld [vmem:[#allocation15] sm:$0xff]   ;;  %v1532_v25 = vld [vmem:[#allocation13 + $0x10] sm:$0xff]   ;;  %s2483_s16 = sld [smem:[#allocation34_spill]] }
 0x105   : > { %906 = vadd.xlane.f32.xlu1 %v905_v11  ;;  %1377 = vmatpush3.bf16.msra.mxu0 %v1522_v12  ;;  %s656_s10 = scalar_lea.vmem %s2399_s0, %s1285_s28  ;;  %v1533_v26 = vld [vmem:[#allocation15 + $0x8] sm:$0xff]   ;;  %v1534_v27 = vld [vmem:[#allocation13 + $0x18] sm:$0xff]   ;;  %v1535_v28 = vld [vmem:[#allocation15 + $0x10] sm:$0xff]   ;;  %s2484_s5 = sld [smem:[#allocation27_spill]] }
 0x106   : > { %891 = vadd.xlane.f32.xlu0 %v890_v10  ;;  %1378 = vmatprep.subr.bf16.mxu0 %v1855_v0  ;;  %v658_v22 = vld [vmem:[%s656_s10] sm:$0xff]  ;;  %v1536_v29 = vld [vmem:[#allocation13 + $0x20] sm:$0xff]   ;;  %v1537_v30 = vld [vmem:[#allocation15 + $0x18] sm:$0xff]   ;;  %s1320_s22 = sshll.u32 %s1960_s13, 7  ;;  %s2485_s28 = sld [smem:[#allocation36_spill]] }
 0x107   : > { %1356 = vmatprep.subr.bf16.mxu1 %v1855_v0  ;;  %v661_v23 = vpack.c.bf16 %v658_v22, %v658_v22  ;;  %v1538_v31 = vld [vmem:[#allocation13 + $0x28] sm:$0xff]   ;;  %v1539_v32 = vld [vmem:[#allocation15 + $0x20] sm:$0xff]   ;;  %v1540_v33 = vld [vmem:[#allocation13 + $0x30] sm:$0xff]   ;;  %v893_v43 = vstv %s887_s7  ;;  %s1077_s2 = scalar_lea.sflag [#allocation6], %s2261_s11  ;;  %s1857_s13 = smov [#allocation16]  }
 0x108   : > { %1357 = vmatpush3.bf16.msra.mxu1 %v1530_v21  ;;  %v1541_v34 = vld [vmem:[#allocation15 + $0x28] sm:$0xff]   ;;  %v1542_v35 = vld [vmem:[#allocation13 + $0x38] sm:$0xff]   ;;  %v1543_v38 = vld [vmem:[#allocation15 + $0x30] sm:$0xff]  }
 0x109   : > { %1379 = vmatpush3.bf16.msra.mxu0 %v1523_v14  ;;  %1358 = vmatprep.subr.bf16.mxu1 %v1855_v0  ;;  %v2329_v36 = vld [vmem:[%s559_s19] sm:$0xff]  ;;  %v1544_v39 = vld [vmem:[#allocation15 + $0x38] sm:$0xff]   ;;  %v1317_v40 = vld [vmem:[%s2481_s30] ss:$0 sm:$0xff] }
 0x10a   : > { %899 = vadd.xlane.f32.xlu0 %v898_v13  ;;  %1380 = vmatprep.subr.bf16.mxu0 %v1855_v0  ;;  %v678_v37 = vpack.c.bf16 %v2329_v36, %v2329_v36  ;;  %v1060_v41 = vmul.f32 %v1317_v40, %v2295_v1  ;;  %v1324_v62 = vld [vmem:[%s2279_s17] sm:$0xff]   ;;  %v1307_v63 = vld [vmem:[%s2279_s17 + $0x8] sm:$0xf]  ;;  %s652_s17 = scalar_lea.vmem [#allocation16], %s2264_s26  ;;  %s1765_s26 = sshll.u32 %s1857_s13, 4  ;;  %s1766_s26 = int_to_ptr.vmem [resolvable:$false] %s1765_s26 }
 0x10b   : > { %v1326_v1 = vunpack.c.h.bf16 %v1324_v62  ;;  %v937_v6 = vunpack.c.l.bf16 %v1307_v63  ;;  %s1090_s21 = sshll.u32 %s652_s17, 4  ;;  %p2486_p12 = scmp.ne.s32.totalorder %s2484_s5, 0  ;;  %s2357_s21 = int_to_ptr.vmem [resolvable:$true] %s1090_s21 }
 0x10c   : > { %1359 = vmatpush3.bf16.msra.mxu1 %v1532_v25  ;;  %1061 = vadd.xlane.f32.xlu1 %v1060_v41  ;;  %v1308_v25 = vld [vmem:[%s2483_s16] ss:$0 sm:$0xff]  ;;  %s2355_s27 = scalar_lea.hbm %s2485_s28, %s1320_s22  ;;  %s1761_s10 = scalar_lea.vmem %s2357_s21, 128 }
 0x10d   : > { %1381 = vmatpush3.bf16.msra.mxu0 %v1524_v15  ;;  %1360 = vmatprep.subr.bf16.mxu1 %v1855_v0  ;;  %p1762_p10 = scmp.ne.s32.totalorder %s2357_s21, %s1761_s10  ;;  %s1767_s12 = scalar_lea.vmem %s1766_s26, 256 }
 0x10e   : > { %1382 = vmatprep.subr.bf16.mxu0 %v1855_v0  ;;  %p1768_p6 = scmp.lt.s32.totalorder %s2357_s21, %s1766_s26  ;;  %p1769_p5 = scmp.lt.s32.totalorder %s1767_s12, %s1761_s10 }
 0x10f   : > { %p1763_p1 = pnand %p1762_p10, %p2486_p12 }
 0x110   : > { %1361 = vmatpush3.bf16.msra.mxu1 %v1534_v27  ;;  %p1770_p4 = por %p1769_p5, %p1768_p6 }
 0x111   : > { %1383 = vmatpush3.bf16.msra.mxu0 %v1525_v16  ;;  %1362 = vmatprep.subr.bf16.mxu1 %v1855_v0  ;;  %p1764_p9 = pneg %p1763_p1 }
 0x112   : > { %1384 = vmatprep.subr.bf16.mxu0 %v1855_v0 }
 0x113   : > { %p1771_p2 = pnand %p1770_p4, %p1764_p9 }
 0x114   : > { %1363 = vmatpush3.bf16.msra.mxu1 %v1536_v29 }
 0x115   : > { %1385 = vmatpush3.bf16.msra.mxu0 %v1526_v17  ;;  %1364 = vmatprep.subr.bf16.mxu1 %v1855_v0  ;;  %v1064_v17 = vstv %s1063_s29 }
 0x116   : > { %1386 = vmatprep.subr.bf16.mxu0 %v1855_v0 }
 0x118   : > { %1365 = vmatpush3.bf16.msra.mxu1 %v1538_v31 }
 0x119   : > { %1387 = vmatpush3.bf16.msra.mxu0 %v1527_v18  ;;  %1366 = vmatprep.subr.bf16.mxu1 %v1855_v0 }
 0x11a   : > { %1388 = vmatprep.subr.bf16.mxu0 %v1855_v0 }
 0x11c   : > { %1367 = vmatpush3.bf16.msra.mxu1 %v1540_v33 }
 0x11d   : > { %1389 = vmatpush3.bf16.msra.mxu0 %v1529_v20  ;;  %1368 = vmatprep.subr.bf16.mxu1 %v1855_v0 }
 0x11e   : > { %1394 = vmatprep.subr.bf16.mxu0 %v1855_v0 }
 0x120   : > { %1391 = vmatmul.mubr.bf16.vlgmr.msra.gmra.mrb[0].mxu0 %v661_v23  ;;  %1369 = vmatpush3.bf16.msra.mxu1 %v1542_v35  ;;  %v1302_v23 = vld [vmem:[%s2482_s23] ss:$0 sm:$0xff] }
 0x121   : > { %1395 = vmatpush3.bf16.msra.mxu0 %v1531_v24  ;;  %1410 = vmatprep.mubr.msk.bf16.mxu0 %vm1856_vm0, %v1855_v0 }
 0x122   : > { %1396 = vmatprep.subr.bf16.mxu0 %v1855_v0 }
 0x123   : > { %1371 = vmatmul.mubr.bf16.vlgmr.msra.gmra.mrb[0].mxu1 %v678_v37 }
 0x125   : > { %1397 = vmatpush3.bf16.msra.mxu0 %v1533_v26 }
 0x126   : > { %1398 = vmatprep.subr.bf16.mxu0 %v1855_v0 }
 0x129   : > { %1399 = vmatpush3.bf16.msra.mxu0 %v1535_v28 }
 0x12a   : > { %1400 = vmatprep.subr.bf16.mxu0 %v1855_v0 }
 0x12d   : > { %1401 = vmatpush3.bf16.msra.mxu0 %v1537_v30 }
 0x12e   : > { %1402 = vmatprep.subr.bf16.mxu0 %v1855_v0 }
 0x131   : > { %1403 = vmatpush3.bf16.msra.mxu0 %v1539_v32 }
 0x132   : > { %1404 = vmatprep.subr.bf16.mxu0 %v1855_v0 }
 0x135   : > { %1405 = vmatpush3.bf16.msra.mxu0 %v1541_v34 }
 0x136   : > { %1406 = vmatprep.subr.bf16.mxu0 %v1855_v0 }
 0x139   : > { %1407 = vmatpush3.bf16.msra.mxu0 %v1543_v38 }
 0x13a   : > { %1408 = vmatprep.subr.bf16.mxu0 %v1855_v0  ;;  %v1325_v0 = vunpack.c.l.bf16 %v1324_v62 }
 0x13d   : > { %1409 = vmatpush3.bf16.msra.mxu0 %v1544_v39 }
 0x192   : > { %v907_v44 = vpop.xlane.xlu1 %906 }
 0x193   : > { %v892_v42 = vpop.xlane.xlu0 %891  ;;  %v908_v48 = vadd.f32 %v907_v44, %v893_v43 }
 0x194   : > { %v894_v46 = vadd.f32 %v893_v43, %v892_v42 }
 0x197   : > { %v900_v45 = vpop.xlane.xlu0 %899 }
 0x198   : > { %v901_v47 = vadd.f32 %v900_v45, %v893_v43 }
 0x199   : > { %v1062_v18 = vpop.xlane.xlu1 %1061 }
 0x19a   : > { %v909_v49 = vmax.f32 %v894_v46, %v901_v47  ;;  %v1065_v19 = vadd.f32 %v1064_v17, %v1062_v18 }
 0x19c   : > { %v910_v50 = vmax.f32 %v909_v49, %v908_v48  ;;  %v1318_v20 = vmul.f32 -1.442695, %v1065_v19 }
 0x19e   : > { %v911_v51 = vsub.f32 %v894_v46, %v910_v50  ;;  %v914_v52 = vsub.f32 %v901_v47, %v910_v50  ;;  %v917_v53 = vsub.f32 %v908_v48, %v910_v50 }
 0x1a0   : > { %v912_v54 = vmul.f32 1.442695, %v911_v51  ;;  %v915_v55 = vmul.f32 1.442695, %v914_v52  ;;  %v918_v56 = vmul.f32 1.442695, %v917_v53 }
 0x1a2   : > { %1545 = vpow2.f32 %v912_v54 }
 0x1a3   : > { %1547 = vpow2.f32 %v915_v55 }
 0x1a4   : > { %1549 = vpow2.f32 %v918_v56 }
 0x1ac   : > { %v1546_v57 = vpop.eup %1545 }
 0x1ad   : > { %v1548_v58 = vpop.eup %1547 }
 0x1ae   : > { %v920_v59 = vadd.f32 %v1548_v58, %v1546_v57  ;;  %v1550_v60 = vpop.eup %1549 }
 0x1b0   : > { %v921_v61 = vadd.f32 %v1550_v60, %v920_v59 }
 0x1b2   : > { %1551 = vrcp.f32 %v921_v61 }
 0x1b3   : > { %1553 = vpow2.f32 %v1318_v20 }
 0x1bc   : > { %v1552_v2 = vpop.eup %1551 }
 0x1bd   : > { %v924_v3 = vmul.f32 %v1552_v2, %v1546_v57  ;;  %v928_v4 = vmul.f32 %v1552_v2, %v1548_v58  ;;  %v934_v5 = vmul.f32 %v1552_v2, %v1550_v60  ;;  %v1554_v21 = vpop.eup %1553 }
 0x1be   : > { %v1069_v22 = vadd.f32 1.0, %v1554_v21 }
 0x1bf   : > { %v927_v7 = vmul.f32 %v1325_v0, %v924_v3  ;;  %v932_v8 = vmul.f32 %v1326_v1, %v928_v4  ;;  %v938_v10 = vmul.f32 %v937_v6, %v934_v5 }
 0x1c0   : > { %1555 = vrcp.f32 %v1069_v22 }
 0x1c1   : > { %v933_v9 = vadd.f32 %v932_v8, %v927_v7 }
 0x1c3   : > { %v939_v11 = vadd.f32 %v938_v10, %v933_v9 }
 0x1c5   : > { %v940_v12 = vpack.c.bf16 %v939_v11, %v939_v11 }
 0x1c7   : > { %1411 = vmatmul.mubr.bf16.vlgmr.msra.gmra.mrb[0].mxu0 %v940_v12 }
 0x1ca   : > { %v1556_v30 = vpop.eup %1555 }
 0x1f6   : > { %v777_v13 = vpop.f32.mrb[0].mxu1 }
 0x1f7   : > { %v1372_v14 = vpop.f32.mrb[1].mxu1  ;;  %v1414_v24 = vadd.f32 %v1302_v23, %v777_v13 }
 0x1f8   : > { %v780_v15 = vpop.f32.mrb[2].mxu1 }
 0x1f9   : > { %v1373_v16 = vpop.f32.mrb[3].mxu1  ;;  %v1415_v26 = vadd.f32 %v1414_v24, %v1308_v25 }
 0x29a   : > { %v1046_v27 = vpop.f32.mrb[0].mxu0 }
 0x29b   : > { %v1416_v28 = vadd.f32 %v1415_v26, %v1046_v27  ;;  %v1412_v29 = vpop.f32.mrb[1].mxu0 }
 0x29c   : > { %v1049_v31 = vpop.f32.mrb[2].mxu0 }
 0x29d   : > { %v1072_v32 = vsub.f32 %v2329_v36, %v1416_v28  ;;  %v1413_v33 = vpop.f32.mrb[3].mxu0 }
 0x29f   : > { %v1073_v34 = vmul.f32 %v1556_v30, %v1072_v32 }
 0x2a1   : > { %v1074_v35 = vadd.f32 %v1416_v28, %v1073_v34 }
 0x2a3   : > { %1075 = vst [vmem:[%s652_s17] sm:$0xff] %v1074_v35 }
 0x2a4   : > { %1774 = shalt.err (!%p1771_p2)
}
 0x2a5   : > { %s1775_s11 = scalar_lea.hbm %s2355_s27, 128  ;;  %s1779_s7 = scalar_lea.hbm %s2485_s28, 256 }
 0x2a6   : > { %p1776_p3 = scmp.ne.s32.totalorder %s2355_s27, %s1775_s11  ;;  %p1780_p8 = scmp.lt.u32.totalorder %s2355_s27, %s2485_s28 }
 0x2a7   : > { %p1781_p13 = scmp.lt.u32.totalorder %s1779_s7, %s1775_s11  ;;  %p1783_p10 = scmp.lt.u32.totalorder %s1775_s11, %s2355_s27 }
 0x2a8   : > { %p1777_p11 = pnand %p1776_p3, %p2486_p12 }
 0x2a9   : > { %p1782_p7 = por %p1781_p13, %p1780_p8 }
 0x2aa   : > { %p1778_p0 = pneg %p1777_p11 }
 0x2ab   : > { %p1784_p1 = por %p1783_p10, %p1782_p7 }
 0x2ad   : > { %p1785_p9 = pnand %p1784_p1, %p1778_p0 }
 0x2af   : > { %1788 = shalt.err (!%p1785_p9)
}
 0x2b0   : > { %1444 = dma.vmem_to_hbm [thread:$0]  (%p2486_p12), %s2357_s21, 128, %s2355_s27, %s1077_s2  }
 0x2b1 PF: > { %s2487_s14 = sld [smem:[#allocation23_spill]]  ;;  %s2488_s23 = sld [smem:[#allocation25_spill]] }
 0x2b2   : > { %p2490_p5 = scmp.ge.s32.totalorder %s1843_s9, 2 }
 0x2b7   : > { %s1102_s15 = sand.u32 1, %s2487_s14   ;;  %p2489_p6 = scmp.ne.s32.totalorder %s2488_s23, 0 }
 0x2b8   : > { %s1103_s19 = scalar_lea.sflag [#allocation6], %s1102_s15 }
 0x2b9   : > { %p1470_p4 = pnand %p2490_p5, %p2489_p6 }
 0x2bb   : > { %1826 = dma.done.wait (!%p1470_p4), %s1103_s19, 128  }
 0x2bc   : > { %1828 = vsyncadd (!%p1470_p4), %s1103_s19, 4294967168  ;;  %s2491_s9 = sld [smem:[#allocation26_spill]]  ;;  %s2492_s16 = sld [smem:[#allocation24_spill]] }
 0x2bd   : > { %s2493_s19 = sld [smem:[#allocation28_spill]]  ;;  %s2494_s17 = smov %s1835_s18 }
 0x2c2   : > { %p36_p2 = scmp.ge.s32.totalorder %s2491_s9, 4   ;;  %s2495_s18 = smov %s2492_s16 }
 0x2c4   :  { %38 = sbr.rel (!%p36_p2) target bundleno = 21 (0x15), region = 177 }
 0x2cb   :  { %1108 = vsyncpa [#allocation5], 1 }
 0x2cc   :  { %1110 = vsyncpa [#allocation5 + $0x1], 1 }
 0x2cd   :  { %1111 = vsyncpa [#allocation8], 1 }
 0x2ce   :  { %1113 = vsyncpa [#allocation8 + $0x1], 1 }
 0x2cf   :  { %1114 = vsyncpa [#allocation11], 1 }
 0x2d0   :  { %1116 = vsyncpa [#allocation11 + $0x1], 1 }
 0x2d1   :  { %1117 = vsyncpa [#allocation14], 1 }
 0x2d2   :  { %1118 = vsyncpa [#allocation6], 1 }
 0x2d3   :  { %1120 = vsyncpa [#allocation6 + $0x1], 1 }

// kernel: _write_unit_impl.1
= control target key start
LH: loop header
LB: loop body
LE: loop exit
PB: predicated region body
PF: predicated region fallthrough
CT: control target
= control target key end

     0   :  { %s2399_s0 = inlined_call_operand.vmem [shape: f32[16,128], index: 0, kind: input, shape index: {}]   ;;  %s2400_s1 = inlined_call_operand.hbm [shape: f32[16,128], index: 1, kind: input, shape index: {}]   ;;  %s2401_s2 = inlined_call_operand.hbm [shape: f32[16,128], index: 2, kind: input, shape index: {}]   ;;  %s2402_s3 = inlined_call_operand.hbm [shape: bf16[3,16,128], index: 3, kind: input, shape index: {}]   ;;  %s2403_s4 = inlined_call_operand.hbm [shape: bf16[3,16,128], index: 4, kind: input, shape index: {}]   ;;  %s2404_s5 = inlined_call_operand.hbm [shape: bf16[128,128], index: 5, kind: input, shape index: {}]   ;;  %s2405_s6 = inlined_call_operand.hbm [shape: bf16[128,128], index: 6, kind: input, shape index: {}]   ;;  %s2406_s7 = inlined_call_operand.vmem [shape: f32[1,128], index: 7, kind: input, shape index: {}]   ;;  %s2407_s8 = inlined_call_operand.vmem [shape: f32[1,128], index: 8, kind: input, shape index: {}]   ;;  %s2408_s9 = inlined_call_operand.<no memory space> [shape: f32[1], index: 9, kind: input, shape index: {}]   ;;  %s2409_s10 = inlined_call_operand.hbm [shape: bf16[128,128], index: 10, kind: input, shape index: {}]   ;;  %s2410_s11 = inlined_call_operand.vmem [shape: f32[1,128], index: 11, kind: input, shape index: {}]   ;;  %s2411_s12 = inlined_call_operand.vmem [shape: f32[1,128], index: 12, kind: input, shape index: {}]   ;;  %s2412_s13 = inlined_call_operand.<no memory space> [shape: f32[1], index: 13, kind: input, shape index: {}]   ;;  %s2413_s14 = inlined_call_operand.hbm [shape: f32[16,128], index: 14, kind: output, shape index: {}]  }
   0x1   :  { %2438 = sst [smem:[#allocation29_spill]] %s2401_s2 }
   0x2   :  { %2439 = sst [smem:[#allocation30_spill]] %s2404_s5 }
   0x3   :  { %2440 = sst [smem:[#allocation31_spill]] %s2405_s6 }
   0x4   :  { %2441 = sst [smem:[#allocation32_spill]] %s2406_s7 }
   0x5   :  { %2442 = sst [smem:[#allocation33_spill]] %s2409_s10 }
   0x6   :  { %2443 = sst [smem:[#allocation34_spill]] %s2410_s11 }
   0x7   :  { %2444 = sst [smem:[#allocation35_spill]] %s2411_s12 }
   0x8   :  { %2445 = sst [smem:[#allocation36_spill]] %s2413_s14 }
   0x9   :  { %19 = sst [smem:[#allocation2]] %s2408_s9 }
   0xa   :  { %20 = sst [smem:[#allocation3]] %s2412_s13 }
   0xb   :  { %21 = vsyncpa [#allocation5], 0 }
   0xc   :  { %23 = vsyncpa [#allocation5 + $0x1], 0 }
   0xd   :  { %24 = vsyncpa [#allocation8], 0 }
   0xe   :  { %26 = vsyncpa [#allocation8 + $0x1], 0 }
   0xf   :  { %27 = vsyncpa [#allocation11], 0 }
  0x10   :  { %29 = vsyncpa [#allocation11 + $0x1], 0 }
  0x11   :  { %30 = vsyncpa [#allocation14], 0 }
  0x12   :  { %31 = vsyncpa [#allocation6], 0 }
  0x13   :  { %33 = vsyncpa [#allocation6 + $0x1], 0  ;;  %s1939_s17 = smov 0   ;;  %s1941_s18 = smov 0  }
  0x14   :  { %s1943_s19 = smov 0   ;;  %s1945_s9 = smov 0  }
  0x15 LB: > { %2446 = sst [smem:[#allocation23_spill]] %s1831_s17  ;;  %s1960_s13 = sadd.s32 4294967295, %s1843_s9   ;;  %s1843_s9 = sphi %s1945_s9, %s2491_s9   ;;  %s1839_s19 = sphi %s1943_s19, %s2493_s19   ;;  %s1835_s18 = sphi %s1941_s18, %s2495_s18   ;;  %s1831_s17 = sphi %s1939_s17, %s2494_s17  }
  0x16   : > { %2447 = sst [smem:[#allocation24_spill]] %s1839_s19  ;;  %s1266_s20 = sadd.s32 4294967294, %s1843_s9  }
  0x17   : > { %p85_p0 = scmp.ne.s32.totalorder %s1835_s18, %s1831_s17  ;;  %p2415_p1 = scmp.eq.s32.totalorder %s1960_s13, 0 }
  0x18   : > { %p382_p3 = scmp.eq.s32.totalorder %s1266_s20, 1  ;;  %p1267_p5 = scmp.ge.s32.totalorder %s1843_s9, 1 }
  0x19   : > { %p1969_p4 = por %p2415_p1, %p85_p0  ;;  %p389_p7 = scmp.lt.s32.totalorder %s1843_s9, 3 }
  0x1a   : > { %p1974_p6 = por %p382_p3, %p85_p0  ;;  %s1845_s24 = smov [#allocation12]  }
  0x1b   : > { %s2448_s21 = scalar_select %p1969_p4, 1, 0 }
  0x1c   : > { %s2449_s22 = scalar_select %p1974_p6, 1, 0 }
  0x1d   : > { %p1979_p8 = pnand %p1267_p5, %p389_p7  ;;  %s401_s25 = sshll.u32 %s1845_s24, 4  ;;  %s1983_s25 = int_to_ptr.vmem [resolvable:$true] %s401_s25 }
  0x1e   : > { %2450 = sst [smem:[#allocation25_spill]] %s2449_s22  ;;  %s1846_s27 = smov [#allocation13]  }
  0x1f   : > { %s2451_s23 = scalar_select %p1979_p8, 1, 0 }
  0x20   : > { %p1446_p9 = pneg %p1979_p8  ;;  %s414_s28 = sshll.u32 %s1846_s27, 4  ;;  %s1994_s28 = int_to_ptr.vmem [resolvable:$true] %s414_s28 }
  0x21   : > { %s2453_s5 = sld [smem:[#allocation30_spill]] }
  0x22   : > { %p1990_p11 = pnand %p1446_p9, %p2415_p1 }
  0x24   : > { %s2452_s26 = scalar_select %p1990_p11, 1, 0 }
  0x25   : > { %p2004_p13 = pneg %p1990_p11 }
  0x27   : > { %s1557_s15 = scalar_lea.hbm %s2453_s5, 1024 }
  0x28   : > { %p1558_p12 = scmp.ne.s32.totalorder %s2453_s5, %s1557_s15  ;;  %p1564_p5 = scmp.lt.u32.totalorder %s1557_s15, %s2453_s5 }
  0x29   : > { %s2454_s24 = scalar_select %p2004_p13, 1, 0 }
  0x2a   : > { %p1560_p0 = pnand %p2004_p13, %p1558_p12 }
  0x2c   : > { %p1561_p3 = pneg %p1560_p0 }
  0x2e   : > { %p1566_p7 = pnand %p1564_p5, %p1561_p3 }
  0x30   : > { %1569 = shalt.err (!%p1566_p7)
}
  0x31   : > { %s1570_s29 = scalar_lea.vmem %s1983_s25, 1024  ;;  %p1578_p2 = scmp.lt.s32.totalorder %s1983_s25, %s1983_s25 }
  0x32   : > { %p1571_p9 = scmp.ne.s32.totalorder %s1983_s25, %s1570_s29  ;;  %p1579_p6 = scmp.lt.s32.totalorder %s1570_s29, %s1570_s29 }
  0x34   : > { %p1573_p10 = pnand %p1571_p9, %p2004_p13  ;;  %p1580_p12 = por %p1579_p6, %p1578_p2 }
  0x36   : > { %p1574_p1 = pneg %p1573_p10 }
  0x38   : > { %p1581_p0 = pnand %p1580_p12, %p1574_p1 }
  0x3a   : > { %1584 = shalt.err (!%p1581_p0)
}
  0x3b   : > { %s2418_s30 = smov 64   ;;  %s2420_s22 = smov 4  }
  0x3c   : > { %1449 = dma.hbm_to_vmem [thread:$0]  (!%p1990_p11), %s2453_s5, 1024, %s1983_s25, [#allocation11], %s2418_s30, %s2418_s30, %s2420_s22  }
  0x3d   : > { %s2455_s6 = sld [smem:[#allocation31_spill]] }
  0x43   : > { %s1585_s29 = scalar_lea.hbm %s2455_s6, 1024 }
  0x44   : > { %p1586_p1 = scmp.ne.s32.totalorder %s2455_s6, %s1585_s29  ;;  %p1592_p10 = scmp.lt.u32.totalorder %s1585_s29, %s2455_s6 }
  0x46   : > { %p1588_p2 = pnand %p1586_p1, %p2004_p13 }
  0x48   : > { %p1589_p6 = pneg %p1588_p2 }
  0x4a   : > { %p1594_p3 = pnand %p1592_p10, %p1589_p6 }
  0x4c   : > { %1597 = shalt.err (!%p1594_p3)
}
  0x4d   : > { %s1598_s25 = scalar_lea.vmem %s1994_s28, 1024  ;;  %p1606_p12 = scmp.lt.s32.totalorder %s1994_s28, %s1994_s28 }
  0x4e   : > { %p1599_p5 = scmp.ne.s32.totalorder %s1994_s28, %s1598_s25  ;;  %p1607_p0 = scmp.lt.s32.totalorder %s1598_s25, %s1598_s25 }
  0x50   : > { %p1601_p7 = pnand %p1599_p5, %p2004_p13  ;;  %p1608_p1 = por %p1607_p0, %p1606_p12 }
  0x52   : > { %p1602_p9 = pneg %p1601_p7 }
  0x54   : > { %p1609_p2 = pnand %p1608_p1, %p1602_p9 }
  0x56   : > { %1612 = shalt.err (!%p1609_p2)
}
  0x57   : > { %1452 = dma.hbm_to_vmem [thread:$0]  (!%p1990_p11), %s2455_s6, 1024, %s1994_s28, [#allocation14], %s2418_s30, %s2418_s30, %s2420_s22  }
  0x58   : > { %s2055_s14 = sadd.s32 1, %s1843_s9   ;;  %s72_s17 = sadd.s32 1, %s1839_s19 }
  0x59   : > { %2456 = sst [smem:[#allocation26_spill]] %s2055_s14  ;;  %s69_s15 = ssub.s32 %s1843_s9, %s2055_s14 }
  0x5a   : > { %p79_p6 = scmp.ne.s32.totalorder %s1839_s19, %s1835_s18  ;;  %p70_p10 = scmp.eq.s32.totalorder %s69_s15, 0 }
  0x5b   : > { %p80_p3 = scmp.eq.s32.totalorder %s1843_s9, 0  ;;  %p2457_p5 = scmp.eq.s32.totalorder %s1960_s13, 1 }
  0x5c   : > { %p1476_p9 = scmp.lt.s32.totalorder %s1843_s9, 2  ;;  %s2074_s28 = sand.u32 1, %s1839_s19  }
  0x5d   : > { %p2065_p7 = por %p2457_p5, %p79_p6  ;;  %p81_p12 = por %p80_p3, %p79_p6 }
  0x5e   : > { %s2071_s20 = scalar_select %p70_p10, %s1839_s19, %s72_s17  }
  0x5f   : > { %s2458_s16 = scalar_select %p2065_p7, 1, 0 }
  0x60   : > { %2460 = sst [smem:[#allocation28_spill]] %s2071_s20  ;;  %s2422_s27 = sshll.u32 %s2074_s28, 3 }
  0x61   : > { %2459 = sst [smem:[#allocation27_spill]] %s2458_s16  ;;  %s2423_s29 = sshll.u32 %s1843_s9, 7 }
  0x62   : > { %p2078_p0 = pnand %p1476_p9, %p81_p12  ;;  %s2426_s7 = sand.u32 1, %s1843_s9  }
  0x63   : > { %s2462_s2 = sld [smem:[#allocation29_spill]]  ;;  %s488_s30 = scalar_lea.vmem [#allocation7], %s2422_s27 }
  0x64   : > { %s2461_s25 = scalar_select %p2078_p0, 1, 0 }
  0x65   : > { %s495_s22 = sshll.u32 %s488_s30, 4  ;;  %s2097_s6 = scalar_lea.sflag [#allocation8], %s2426_s7  ;;  %s2093_s22 = int_to_ptr.vmem [resolvable:$true] %s495_s22 }
  0x66   : > { %p2103_p2 = pneg %p2078_p0 }
  0x69   : > { %s2088_s17 = scalar_lea.hbm %s2462_s2, %s2423_s29  ;;  %s1618_s30 = scalar_lea.hbm %s2462_s2, 256 }
  0x6a   : > { %s1613_s20 = scalar_lea.hbm %s2088_s17, 128  ;;  %p1619_p3 = scmp.lt.u32.totalorder %s2088_s17, %s2462_s2 }
  0x6b   : > { %p1614_p1 = scmp.ne.s32.totalorder %s2088_s17, %s1613_s20  ;;  %p1620_p5 = scmp.lt.u32.totalorder %s1618_s30, %s1613_s20 }
  0x6c   : > { %p1622_p12 = scmp.lt.u32.totalorder %s1613_s20, %s2088_s17 }
  0x6d   : > { %p1616_p6 = pnand %p2103_p2, %p1614_p1  ;;  %p1621_p9 = por %p1620_p5, %p1619_p3 }
  0x6f   : > { %p1617_p10 = pneg %p1616_p6  ;;  %p1623_p7 = por %p1622_p12, %p1621_p9 }
  0x71   : > { %p1624_p4 = pnand %p1623_p7, %p1617_p10 }
  0x73   : > { %1627 = shalt.err (!%p1624_p4)
}
  0x74   : > { %s1628_s7 = scalar_lea.vmem %s2093_s22, 128  ;;  %s1849_s27 = smov [#allocation7]  }
  0x75   : > { %p1629_p1 = scmp.ne.s32.totalorder %s2093_s22, %s1628_s7  ;;  %s1633_s15 = sshll.u32 %s1849_s27, 4  ;;  %s1634_s15 = int_to_ptr.vmem [resolvable:$false] %s1633_s15 }
  0x76   : > { %s1635_s5 = scalar_lea.vmem %s1634_s15, 256  ;;  %p1636_p11 = scmp.lt.s32.totalorder %s2093_s22, %s1634_s15 }
  0x77   : > { %p1631_p6 = pnand %p1629_p1, %p2103_p2  ;;  %p1637_p13 = scmp.lt.s32.totalorder %s1635_s5, %s1628_s7 }
  0x79   : > { %p1632_p8 = pneg %p1631_p6  ;;  %p1638_p3 = por %p1637_p13, %p1636_p11 }
  0x7b   : > { %p1639_p5 = pnand %p1638_p3, %p1632_p8 }
  0x7d   : > { %1642 = shalt.err (!%p1639_p5)
}
  0x7e   : > { %1462 = dma.hbm_to_vmem [thread:$0]  (!%p2078_p0), %s2088_s17, 128, %s2093_s22, %s2097_s6  }
  0x7f   : > { %s2464_s20 = smul.u32 12, %s2074_s28  ;;  %s1850_s7 = smov [#allocation15]  }
  0x80   : > { %s436_s5 = sshll.u32 %s1850_s7, 4  ;;  %s2466_s19 = sshll.u32 %s1843_s9, 7  ;;  %s437_s5 = int_to_ptr.vmem [resolvable:$true] %s436_s5 }
  0x81   : > { %s506_s29 = scalar_lea.vmem [#allocation9], %s2464_s20  ;;  %s2465_s27 = smov %s2464_s20 }
  0x82   : > { %s512_s30 = sshll.u32 %s506_s29, 4  ;;  %s526_s2 = scalar_lea.vmem [#allocation10], %s2465_s27  ;;  %s2131_s30 = int_to_ptr.vmem [resolvable:$true] %s512_s30 }
  0x83   : > { %s532_s15 = sshll.u32 %s526_s2, 4  ;;  %s2140_s12 = scalar_lea.hbm %s2400_s1, %s2466_s19  ;;  %s2133_s15 = int_to_ptr.vmem [resolvable:$true] %s532_s15 }
  0x84   : > { %s2467_s10 = sld [smem:[#allocation33_spill]]  ;;  %p2468_p8 = scmp.ne.s32.totalorder %s2454_s24, 0 }
  0x8a   : > { %s1643_s20 = scalar_lea.hbm %s2467_s10, 1024 }
  0x8b   : > { %p1644_p4 = scmp.ne.s32.totalorder %s2467_s10, %s1643_s20  ;;  %p1650_p7 = scmp.lt.u32.totalorder %s1643_s20, %s2467_s10 }
  0x8d   : > { %p1646_p11 = pnand %p1644_p4, %p2468_p8 }
  0x8f   : > { %p1647_p13 = pneg %p1646_p11 }
  0x91   : > { %p1652_p10 = pnand %p1650_p7, %p1647_p13 }
  0x93   : > { %1655 = shalt.err (!%p1652_p10)
}
  0x94   : > { %s1656_s14 = scalar_lea.vmem %s437_s5, 1024  ;;  %p1664_p6 = scmp.lt.s32.totalorder %s437_s5, %s437_s5 }
  0x95   : > { %p1657_p9 = scmp.ne.s32.totalorder %s437_s5, %s1656_s14  ;;  %p1665_p3 = scmp.lt.s32.totalorder %s1656_s14, %s1656_s14 }
  0x97   : > { %p1659_p12 = pnand %p1657_p9, %p2468_p8  ;;  %p1666_p5 = por %p1665_p3, %p1664_p6 }
  0x99   : > { %p1660_p1 = pneg %p1659_p12 }
  0x9b   : > { %p1667_p0 = pnand %p1666_p5, %p1660_p1 }
  0x9d   : > { %1670 = shalt.err (!%p1667_p0)
}
  0x9e   : > { %p2469_p4 = scmp.ne.s32.totalorder %s2452_s26, 0  ;;  %s2470_s19 = smov 4  }
  0x9f   : > { %s2471_s16 = smov 64   ;;  %s2472_s24 = sshll.u32 %s2074_s28, 3 }
  0xa0   : > { %1455 = dma.hbm_to_vmem [thread:$0]  (!%p2469_p4), %s2467_s10, 1024, %s437_s5, [#allocation14], %s2471_s16, %s2471_s16, %s2470_s19  }
  0xa1   : > { %s470_s20 = scalar_lea.vmem [#allocation4], %s2472_s24  ;;  %s1276_s26 = sshll.u32 %s1843_s9, 6 }
  0xa2   : > { %s477_s29 = sshll.u32 %s470_s20, 4  ;;  %s2173_s7 = scalar_lea.hbm %s2402_s3, %s1276_s26  ;;  %s2166_s29 = int_to_ptr.vmem [resolvable:$true] %s477_s29 }
  0xa3   : > { %s467_s14 = scalar_lea.sflag [#allocation5], %s2074_s28  ;;  %s1671_s22 = scalar_lea.hbm %s2140_s12, 128 }
  0xa4   : > { %p1672_p0 = scmp.ne.s32.totalorder %s2140_s12, %s1671_s22  ;;  %s1676_s24 = scalar_lea.hbm %s2400_s1, 256 }
  0xa5   : > { %p1677_p13 = scmp.lt.u32.totalorder %s2140_s12, %s2400_s1  ;;  %p1678_p7 = scmp.lt.u32.totalorder %s1676_s24, %s1671_s22 }
  0xa6   : > { %p1674_p8 = pnand %p1672_p0, %p2103_p2  ;;  %p1680_p9 = scmp.lt.u32.totalorder %s1671_s22, %s2140_s12 }
  0xa7   : > { %p1679_p10 = por %p1678_p7, %p1677_p13 }
  0xa8   : > { %p1675_p11 = pneg %p1674_p8 }
  0xa9   : > { %p1681_p12 = por %p1680_p9, %p1679_p10 }
  0xab   : > { %p1682_p1 = pnand %p1681_p12, %p1675_p11 }
  0xad   : > { %1685 = shalt.err (!%p1682_p1)
}
  0xae   : > { %s1686_s28 = scalar_lea.vmem %s2166_s29, 128  ;;  %s1851_s27 = smov [#allocation4]  }
  0xaf   : > { %p1687_p6 = scmp.ne.s32.totalorder %s2166_s29, %s1686_s28  ;;  %s1691_s2 = sshll.u32 %s1851_s27, 4  ;;  %s1692_s2 = int_to_ptr.vmem [resolvable:$false] %s1691_s2 }
  0xb0   : > { %s1693_s10 = scalar_lea.vmem %s1692_s2, 256  ;;  %p1694_p4 = scmp.lt.s32.totalorder %s2166_s29, %s1692_s2 }
  0xb1   : > { %p1689_p3 = pnand %p1687_p6, %p2103_p2  ;;  %p1695_p0 = scmp.lt.s32.totalorder %s1693_s10, %s1686_s28 }
  0xb3   : > { %p1690_p5 = pneg %p1689_p3  ;;  %p1696_p8 = por %p1695_p0, %p1694_p4 }
  0xb5   : > { %p1697_p13 = pnand %p1696_p8, %p1690_p5 }
  0xb7   : > { %1700 = shalt.err (!%p1697_p13)
}
  0xb8   : > { %p2473_p11 = scmp.ne.s32.totalorder %s2461_s25, 0  ;;  %s2202_s5 = scalar_lea.hbm %s2403_s4, %s1276_s26 }
  0xb9   : > { %s1701_s24 = scalar_lea.hbm %s2173_s7, 192  ;;  %s1706_s27 = scalar_lea.hbm %s2402_s3, 384 }
  0xba   : > { %1459 = dma.hbm_to_vmem [thread:$0]  (!%p2473_p11), %s2140_s12, 128, %s2166_s29, %s467_s14  }
  0xbb   : > { %p1702_p7 = scmp.ne.s32.totalorder %s2173_s7, %s1701_s24  ;;  %p1707_p12 = scmp.lt.u32.totalorder %s2173_s7, %s2402_s3 }
  0xbc   : > { %p1708_p1 = scmp.lt.u32.totalorder %s1706_s27, %s1701_s24  ;;  %p1710_p3 = scmp.lt.u32.totalorder %s1701_s24, %s2173_s7 }
  0xbd   : > { %p1704_p10 = pnand %p1702_p7, %p2103_p2 }
  0xbe   : > { %p1709_p6 = por %p1708_p1, %p1707_p12 }
  0xbf   : > { %p1705_p9 = pneg %p1704_p10 }
  0xc0   : > { %p1711_p5 = por %p1710_p3, %p1709_p6 }
  0xc2   : > { %p1712_p4 = pnand %p1711_p5, %p1705_p9 }
  0xc4   : > { %1715 = shalt.err (!%p1712_p4)
}
  0xc5   : > { %s1716_s12 = scalar_lea.vmem %s2131_s30, 192  ;;  %s1852_s29 = smov [#allocation9]  }
  0xc6   : > { %p1717_p0 = scmp.ne.s32.totalorder %s2131_s30, %s1716_s12  ;;  %s1721_s26 = sshll.u32 %s1852_s29, 4  ;;  %s1722_s26 = int_to_ptr.vmem [resolvable:$false] %s1721_s26 }
  0xc7   : > { %s1723_s14 = scalar_lea.vmem %s1722_s26, 384  ;;  %p1724_p7 = scmp.lt.s32.totalorder %s2131_s30, %s1722_s26 }
  0xc8   : > { %p1719_p8 = pnand %p1717_p0, %p2103_p2  ;;  %p1725_p10 = scmp.lt.s32.totalorder %s1723_s14, %s1716_s12 }
  0xca   : > { %p1720_p13 = pneg %p1719_p8  ;;  %p1726_p12 = por %p1725_p10, %p1724_p7 }
  0xcc   : > { %p1727_p1 = pnand %p1726_p12, %p1720_p13 }
  0xce   : > { %1730 = shalt.err (!%p1727_p1)
}
  0xcf   : > { %s1853_s22 = smov 128   ;;  %s2474_s17 = sand.u32 1, %s1843_s9  }
  0xd0   : > { %1465 = dma.hbm_to_vmem [thread:$0]  (!%p2473_p11), %s2173_s7, 192, %s2131_s30, %s2097_s6, %s1853_s22, %s2471_s16, %s2470_s19  }
  0xd1   : > { %s2231_s24 = scalar_lea.sflag [#allocation11], %s2474_s17  ;;  %s1731_s20 = scalar_lea.hbm %s2202_s5, 192 }
  0xd2   : > { %p1732_p9 = scmp.ne.s32.totalorder %s2202_s5, %s1731_s20  ;;  %s1736_s2 = scalar_lea.hbm %s2403_s4, 384 }
  0xd3   : > { %p1737_p5 = scmp.lt.u32.totalorder %s2202_s5, %s2403_s4  ;;  %p1738_p4 = scmp.lt.u32.totalorder %s1736_s2, %s1731_s20 }
  0xd4   : > { %p1734_p6 = pnand %p1732_p9, %p2103_p2  ;;  %p1740_p8 = scmp.lt.u32.totalorder %s1731_s20, %s2202_s5 }
  0xd5   : > { %p1739_p0 = por %p1738_p4, %p1737_p5 }
  0xd6   : > { %p1735_p3 = pneg %p1734_p6 }
  0xd7   : > { %p1741_p13 = por %p1740_p8, %p1739_p0 }
  0xd9   : > { %p1742_p7 = pnand %p1741_p13, %p1735_p3 }
  0xdb   : > { %1745 = shalt.err (!%p1742_p7)
}
  0xdc   : > { %s1746_s6 = scalar_lea.vmem %s2133_s15, 192  ;;  %s1854_s30 = smov [#allocation10]  }
  0xdd   : > { %p1747_p10 = scmp.ne.s32.totalorder %s2133_s15, %s1746_s6  ;;  %s1751_s7 = sshll.u32 %s1854_s30, 4  ;;  %s1752_s7 = int_to_ptr.vmem [resolvable:$false] %s1751_s7 }
  0xde   : > { %s1753_s29 = scalar_lea.vmem %s1752_s7, 384  ;;  %p1754_p9 = scmp.lt.s32.totalorder %s2133_s15, %s1752_s7 }
  0xdf   : > { %p1749_p12 = pnand %p1747_p10, %p2103_p2  ;;  %p1755_p6 = scmp.lt.s32.totalorder %s1753_s29, %s1746_s6 }
  0xe1   : > { %p1750_p1 = pneg %p1749_p12  ;;  %p1756_p5 = por %p1755_p6, %p1754_p9 }
  0xe3   : > { %p1757_p4 = pnand %p1756_p5, %p1750_p1 }
  0xe5   : > { %1760 = shalt.err (!%p1757_p4)
}
  0xe6   : > { %1468 = dma.hbm_to_vmem [thread:$0]  (!%p2473_p11), %s2202_s5, 192, %s2133_s15, %s2231_s24, %s1853_s22, %s2471_s16, %s2470_s19  }
  0xe7   : > { %p2475_p2 = scmp.ne.s32.totalorder %s2451_s23, 0 }
  0xe8   : > { %s2261_s11 = sand.u32 (!%p2475_p2), 1, %s1835_s18   ;;  %p2476_p3 = scmp.ne.s32.totalorder (!%p2475_p2), %s2448_s21, 0 }
  0xe9   : > { %544 = sbr.rel (%p2475_p2) target bundleno = 689 (0x2b1), region = 76  ;;  %s2264_s26 = sshll.u32 (!%p2475_p2), %s2261_s11, 3 }
  0xea   : > { %s547_s25 = scalar_lea.sflag (!%p2475_p2), [#allocation5], %s2261_s11  ;;  %s550_s14 = scalar_lea.vmem (!%p2475_p2), [#allocation4], %s2264_s26 }
  0xf0   : > { %1806 = dma.done.wait (%p2476_p3), %s547_s25, 128  }
  0xf1   : > { %1808 = vsyncadd (%p2476_p3), %s547_s25, 4294967168  ;;  %s555_s23 = sand.u32 1, %s1960_s13   ;;  %s559_s19 = scalar_lea.vmem [#allocation7], %s2264_s26 }
  0xf2   : > { %s556_s15 = scalar_lea.sflag [#allocation8], %s555_s23 }
  0xf3   : > { %1810 = dma.done.wait (%p2476_p3), %s556_s15, 320  }
  0xf4   : > { %1812 = vsyncadd (%p2476_p3), %s556_s15, 4294966976  ;;  %s1423_s16 = smul.u32 12, %s2261_s11  ;;  %s574_s22 = scalar_lea.sflag [#allocation11], %s555_s23 }
  0xf6   : > { %s568_s5 = scalar_lea.vmem [#allocation9], %s1423_s16  ;;  %s2279_s17 = scalar_lea.vmem [#allocation10], %s1423_s16 }
  0xf7   : > { %1814 = dma.done.wait (%p2476_p3), %s574_s22, 192  }
  0xf8   : > { %1816 = vsyncadd (%p2476_p3), %s574_s22, 4294967104  ;;  %p2477_p11 = scmp.eq.s32.totalorder %s1960_s13, 0 }
  0xfa   : > { %1818 = dma.done.wait (%p2477_p11), [#allocation11], 1024   ;;  %p2478_p0 = pmov %p2477_p11 }
  0xfc   : > { %1820 = vsyncadd (%p2478_p0), [#allocation11], 4294966272  ;;  %p2479_p8 = pmov %p2478_p0 }
  0xfd   : > { %p2480_p13 = pmov %p2478_p0 }
  0xfe   : > { %1822 = dma.done.wait (%p2479_p8), [#allocation14], 2048  }
  0xff   : > { %1824 = vsyncadd (%p2480_p13), [#allocation14], 4294965248  ;;  %v1855_v0 = vmov 0.0   ;;  %v2295_v1 = vld [vmem:[%s550_s14] sm:$0xff]  ;;  %v1305_v7 = vld [vmem:[%s568_s5 + $0x8] sm:$0xf] }
 0x100   : > { %1374 = vmatprep.subr.bf16.mxu0 %v1855_v0  ;;  %1354 = vmatprep.subr.bf16.mxu1 %v1855_v0  ;;  %v1303_v2 = vld [vmem:[%s2407_s8] ss:$0 sm:$0xff]  ;;  %v904_v8 = vunpack.c.l.bf16 %v1305_v7  ;;  %v1521_v9 = vld [vmem:[#allocation12] sm:$0xff]   ;;  %v1522_v12 = vld [vmem:[#allocation12 + $0x8] sm:$0xff]   ;;  %p653_p7 = scmp.lt.s32.totalorder %s1960_s13, 1  ;;  %vm1856_vm0 = vmmov 0  }
 0x101   : > { %v888_v3 = vld [vmem:[%s568_s5] sm:$0xff]   ;;  %v886_v4 = vmul.f32 %v1303_v2, %v2295_v1  ;;  %1375 = vmatpush3.bf16.msra.mxu0 %v1521_v9  ;;  %v1526_v17 = vld [vmem:[#allocation12 + $0x28] sm:$0xff]   ;;  %1390 = vmatprep.mubr.msk.bf16.mxu0 %vm1856_vm0, %v1855_v0  ;;  %s2481_s30 = sld [smem:[#allocation35_spill]]  ;;  %s887_s7 = sld [smem:[#allocation2]] }
 0x102   : > { %v889_v5 = vunpack.c.l.bf16 %v888_v3  ;;  %v897_v6 = vunpack.c.h.bf16 %v888_v3  ;;  %1376 = vmatprep.subr.bf16.mxu0 %v1855_v0  ;;  %v1523_v14 = vld [vmem:[#allocation12 + $0x10] sm:$0xff]   ;;  %v1524_v15 = vld [vmem:[#allocation12 + $0x18] sm:$0xff]   ;;  %v1525_v16 = vld [vmem:[#allocation12 + $0x20] sm:$0xff]   ;;  %s654_s20 = scalar_select %p653_p7, %s1960_s13, 1  ;;  %1370 = vmatprep.mubr.msk.bf16.mxu1 %vm1856_vm0, %v1855_v0 }
 0x103   : > { %v905_v11 = vmul.f32 %v904_v8, %v886_v4  ;;  %v1527_v18 = vld [vmem:[#allocation12 + $0x30] sm:$0xff]   ;;  %v1528_v19 = vld [vmem:[#allocation13] sm:$0xff]   ;;  %v1529_v20 = vld [vmem:[#allocation12 + $0x38] sm:$0xff]   ;;  %s1063_s29 = sld [smem:[#allocation3]]  ;;  %s2482_s23 = sld [smem:[#allocation32_spill]] }
 0x104   : > { %v890_v10 = vmul.f32 %v889_v5, %v886_v4  ;;  %v898_v13 = vmul.f32 %v897_v6, %v886_v4  ;;  %1355 = vmatpush3.bf16.msra.mxu1 %v1528_v19  ;;  %v1530_v21 = vld [vmem:[#allocation13 + $0x8] sm:$0xff]   ;;  %s1285_s28 = sshll.u32 %s654_s20, 3  ;;  %v1531_v24 = vld [vmem:[#allocation15] sm:$0xff]   ;;  %v1532_v25 = vld [vmem:[#allocation13 + $0x10] sm:$0xff]   ;;  %s2483_s16 = sld [smem:[#allocation34_spill]] }
 0x105   : > { %906 = vadd.xlane.f32.xlu1 %v905_v11  ;;  %1377 = vmatpush3.bf16.msra.mxu0 %v1522_v12  ;;  %s656_s10 = scalar_lea.vmem %s2399_s0, %s1285_s28  ;;  %v1533_v26 = vld [vmem:[#allocation15 + $0x8] sm:$0xff]   ;;  %v1534_v27 = vld [vmem:[#allocation13 + $0x18] sm:$0xff]   ;;  %v1535_v28 = vld [vmem:[#allocation15 + $0x10] sm:$0xff]   ;;  %s2484_s5 = sld [smem:[#allocation27_spill]] }
 0x106   : > { %891 = vadd.xlane.f32.xlu0 %v890_v10  ;;  %1378 = vmatprep.subr.bf16.mxu0 %v1855_v0  ;;  %v658_v22 = vld [vmem:[%s656_s10] sm:$0xff]  ;;  %v1536_v29 = vld [vmem:[#allocation13 + $0x20] sm:$0xff]   ;;  %v1537_v30 = vld [vmem:[#allocation15 + $0x18] sm:$0xff]   ;;  %s1320_s22 = sshll.u32 %s1960_s13, 7  ;;  %s2485_s28 = sld [smem:[#allocation36_spill]] }
 0x107   : > { %1356 = vmatprep.subr.bf16.mxu1 %v1855_v0  ;;  %v661_v23 = vpack.c.bf16 %v658_v22, %v658_v22  ;;  %v1538_v31 = vld [vmem:[#allocation13 + $0x28] sm:$0xff]   ;;  %v1539_v32 = vld [vmem:[#allocation15 + $0x20] sm:$0xff]   ;;  %v1540_v33 = vld [vmem:[#allocation13 + $0x30] sm:$0xff]   ;;  %v893_v43 = vstv %s887_s7  ;;  %s1077_s2 = scalar_lea.sflag [#allocation6], %s2261_s11  ;;  %s1857_s13 = smov [#allocation16]  }
 0x108   : > { %1357 = vmatpush3.bf16.msra.mxu1 %v1530_v21  ;;  %v1541_v34 = vld [vmem:[#allocation15 + $0x28] sm:$0xff]   ;;  %v1542_v35 = vld [vmem:[#allocation13 + $0x38] sm:$0xff]   ;;  %v1543_v38 = vld [vmem:[#allocation15 + $0x30] sm:$0xff]  }
 0x109   : > { %1379 = vmatpush3.bf16.msra.mxu0 %v1523_v14  ;;  %1358 = vmatprep.subr.bf16.mxu1 %v1855_v0  ;;  %v2329_v36 = vld [vmem:[%s559_s19] sm:$0xff]  ;;  %v1544_v39 = vld [vmem:[#allocation15 + $0x38] sm:$0xff]   ;;  %v1317_v40 = vld [vmem:[%s2481_s30] ss:$0 sm:$0xff] }
 0x10a   : > { %899 = vadd.xlane.f32.xlu0 %v898_v13  ;;  %1380 = vmatprep.subr.bf16.mxu0 %v1855_v0  ;;  %v678_v37 = vpack.c.bf16 %v2329_v36, %v2329_v36  ;;  %v1060_v41 = vmul.f32 %v1317_v40, %v2295_v1  ;;  %v1324_v62 = vld [vmem:[%s2279_s17] sm:$0xff]   ;;  %v1307_v63 = vld [vmem:[%s2279_s17 + $0x8] sm:$0xf]  ;;  %s652_s17 = scalar_lea.vmem [#allocation16], %s2264_s26  ;;  %s1765_s26 = sshll.u32 %s1857_s13, 4  ;;  %s1766_s26 = int_to_ptr.vmem [resolvable:$false] %s1765_s26 }
 0x10b   : > { %v1326_v1 = vunpack.c.h.bf16 %v1324_v62  ;;  %v937_v6 = vunpack.c.l.bf16 %v1307_v63  ;;  %s1090_s21 = sshll.u32 %s652_s17, 4  ;;  %p2486_p12 = scmp.ne.s32.totalorder %s2484_s5, 0  ;;  %s2357_s21 = int_to_ptr.vmem [resolvable:$true] %s1090_s21 }
 0x10c   : > { %1359 = vmatpush3.bf16.msra.mxu1 %v1532_v25  ;;  %1061 = vadd.xlane.f32.xlu1 %v1060_v41  ;;  %v1308_v25 = vld [vmem:[%s2483_s16] ss:$0 sm:$0xff]  ;;  %s2355_s27 = scalar_lea.hbm %s2485_s28, %s1320_s22  ;;  %s1761_s10 = scalar_lea.vmem %s2357_s21, 128 }
 0x10d   : > { %1381 = vmatpush3.bf16.msra.mxu0 %v1524_v15  ;;  %1360 = vmatprep.subr.bf16.mxu1 %v1855_v0  ;;  %p1762_p10 = scmp.ne.s32.totalorder %s2357_s21, %s1761_s10  ;;  %s1767_s12 = scalar_lea.vmem %s1766_s26, 256 }
 0x10e   : > { %1382 = vmatprep.subr.bf16.mxu0 %v1855_v0  ;;  %p1768_p6 = scmp.lt.s32.totalorder %s2357_s21, %s1766_s26  ;;  %p1769_p5 = scmp.lt.s32.totalorder %s1767_s12, %s1761_s10 }
 0x10f   : > { %p1763_p1 = pnand %p1762_p10, %p2486_p12 }
 0x110   : > { %1361 = vmatpush3.bf16.msra.mxu1 %v1534_v27  ;;  %p1770_p4 = por %p1769_p5, %p1768_p6 }
 0x111   : > { %1383 = vmatpush3.bf16.msra.mxu0 %v1525_v16  ;;  %1362 = vmatprep.subr.bf16.mxu1 %v1855_v0  ;;  %p1764_p9 = pneg %p1763_p1 }
 0x112   : > { %1384 = vmatprep.subr.bf16.mxu0 %v1855_v0 }
 0x113   : > { %p1771_p2 = pnand %p1770_p4, %p1764_p9 }
 0x114   : > { %1363 = vmatpush3.bf16.msra.mxu1 %v1536_v29 }
 0x115   : > { %1385 = vmatpush3.bf16.msra.mxu0 %v1526_v17  ;;  %1364 = vmatprep.subr.bf16.mxu1 %v1855_v0  ;;  %v1064_v17 = vstv %s1063_s29 }
 0x116   : > { %1386 = vmatprep.subr.bf16.mxu0 %v1855_v0 }
 0x118   : > { %1365 = vmatpush3.bf16.msra.mxu1 %v1538_v31 }
 0x119   : > { %1387 = vmatpush3.bf16.msra.mxu0 %v1527_v18  ;;  %1366 = vmatprep.subr.bf16.mxu1 %v1855_v0 }
 0x11a   : > { %1388 = vmatprep.subr.bf16.mxu0 %v1855_v0 }
 0x11c   : > { %1367 = vmatpush3.bf16.msra.mxu1 %v1540_v33 }
 0x11d   : > { %1389 = vmatpush3.bf16.msra.mxu0 %v1529_v20  ;;  %1368 = vmatprep.subr.bf16.mxu1 %v1855_v0 }
 0x11e   : > { %1394 = vmatprep.subr.bf16.mxu0 %v1855_v0 }
 0x120   : > { %1391 = vmatmul.mubr.bf16.vlgmr.msra.gmra.mrb[0].mxu0 %v661_v23  ;;  %1369 = vmatpush3.bf16.msra.mxu1 %v1542_v35  ;;  %v1302_v23 = vld [vmem:[%s2482_s23] ss:$0 sm:$0xff] }
 0x121   : > { %1395 = vmatpush3.bf16.msra.mxu0 %v1531_v24  ;;  %1410 = vmatprep.mubr.msk.bf16.mxu0 %vm1856_vm0, %v1855_v0 }
 0x122   : > { %1396 = vmatprep.subr.bf16.mxu0 %v1855_v0 }
 0x123   : > { %1371 = vmatmul.mubr.bf16.vlgmr.msra.gmra.mrb[0].mxu1 %v678_v37 }
 0x125   : > { %1397 = vmatpush3.bf16.msra.mxu0 %v1533_v26 }
 0x126   : > { %1398 = vmatprep.subr.bf16.mxu0 %v1855_v0 }
 0x129   : > { %1399 = vmatpush3.bf16.msra.mxu0 %v1535_v28 }
 0x12a   : > { %1400 = vmatprep.subr.bf16.mxu0 %v1855_v0 }
 0x12d   : > { %1401 = vmatpush3.bf16.msra.mxu0 %v1537_v30 }
 0x12e   : > { %1402 = vmatprep.subr.bf16.mxu0 %v1855_v0 }
 0x131   : > { %1403 = vmatpush3.bf16.msra.mxu0 %v1539_v32 }
 0x132   : > { %1404 = vmatprep.subr.bf16.mxu0 %v1855_v0 }
 0x135   : > { %1405 = vmatpush3.bf16.msra.mxu0 %v1541_v34 }
 0x136   : > { %1406 = vmatprep.subr.bf16.mxu0 %v1855_v0 }
 0x139   : > { %1407 = vmatpush3.bf16.msra.mxu0 %v1543_v38 }
 0x13a   : > { %1408 = vmatprep.subr.bf16.mxu0 %v1855_v0  ;;  %v1325_v0 = vunpack.c.l.bf16 %v1324_v62 }
 0x13d   : > { %1409 = vmatpush3.bf16.msra.mxu0 %v1544_v39 }
 0x192   : > { %v907_v44 = vpop.xlane.xlu1 %906 }
 0x193   : > { %v892_v42 = vpop.xlane.xlu0 %891  ;;  %v908_v48 = vadd.f32 %v907_v44, %v893_v43 }
 0x194   : > { %v894_v46 = vadd.f32 %v893_v43, %v892_v42 }
 0x197   : > { %v900_v45 = vpop.xlane.xlu0 %899 }
 0x198   : > { %v901_v47 = vadd.f32 %v900_v45, %v893_v43 }
 0x199   : > { %v1062_v18 = vpop.xlane.xlu1 %1061 }
 0x19a   : > { %v909_v49 = vmax.f32 %v894_v46, %v901_v47  ;;  %v1065_v19 = vadd.f32 %v1064_v17, %v1062_v18 }
 0x19c   : > { %v910_v50 = vmax.f32 %v909_v49, %v908_v48  ;;  %v1318_v20 = vmul.f32 -1.442695, %v1065_v19 }
 0x19e   : > { %v911_v51 = vsub.f32 %v894_v46, %v910_v50  ;;  %v914_v52 = vsub.f32 %v901_v47, %v910_v50  ;;  %v917_v53 = vsub.f32 %v908_v48, %v910_v50 }
 0x1a0   : > { %v912_v54 = vmul.f32 1.442695, %v911_v51  ;;  %v915_v55 = vmul.f32 1.442695, %v914_v52  ;;  %v918_v56 = vmul.f32 1.442695, %v917_v53 }
 0x1a2   : > { %1545 = vpow2.f32 %v912_v54 }
 0x1a3   : > { %1547 = vpow2.f32 %v915_v55 }
 0x1a4   : > { %1549 = vpow2.f32 %v918_v56 }
 0x1ac   : > { %v1546_v57 = vpop.eup %1545 }
 0x1ad   : > { %v1548_v58 = vpop.eup %1547 }
 0x1ae   : > { %v920_v59 = vadd.f32 %v1548_v58, %v1546_v57  ;;  %v1550_v60 = vpop.eup %1549 }
 0x1b0   : > { %v921_v61 = vadd.f32 %v1550_v60, %v920_v59 }
 0x1b2   : > { %1551 = vrcp.f32 %v921_v61 }
 0x1b3   : > { %1553 = vpow2.f32 %v1318_v20 }
 0x1bc   : > { %v1552_v2 = vpop.eup %1551 }
 0x1bd   : > { %v924_v3 = vmul.f32 %v1552_v2, %v1546_v57  ;;  %v928_v4 = vmul.f32 %v1552_v2, %v1548_v58  ;;  %v934_v5 = vmul.f32 %v1552_v2, %v1550_v60  ;;  %v1554_v21 = vpop.eup %1553 }
 0x1be   : > { %v1069_v22 = vadd.f32 1.0, %v1554_v21 }
 0x1bf   : > { %v927_v7 = vmul.f32 %v1325_v0, %v924_v3  ;;  %v932_v8 = vmul.f32 %v1326_v1, %v928_v4  ;;  %v938_v10 = vmul.f32 %v937_v6, %v934_v5 }
 0x1c0   : > { %1555 = vrcp.f32 %v1069_v22 }
 0x1c1   : > { %v933_v9 = vadd.f32 %v932_v8, %v927_v7 }
 0x1c3   : > { %v939_v11 = vadd.f32 %v938_v10, %v933_v9 }
 0x1c5   : > { %v940_v12 = vpack.c.bf16 %v939_v11, %v939_v11 }
 0x1c7   : > { %1411 = vmatmul.mubr.bf16.vlgmr.msra.gmra.mrb[0].mxu0 %v940_v12 }
 0x1ca   : > { %v1556_v30 = vpop.eup %1555 }
 0x1f6   : > { %v777_v13 = vpop.f32.mrb[0].mxu1 }
 0x1f7   : > { %v1372_v14 = vpop.f32.mrb[1].mxu1  ;;  %v1414_v24 = vadd.f32 %v1302_v23, %v777_v13 }
 0x1f8   : > { %v780_v15 = vpop.f32.mrb[2].mxu1 }
 0x1f9   : > { %v1373_v16 = vpop.f32.mrb[3].mxu1  ;;  %v1415_v26 = vadd.f32 %v1414_v24, %v1308_v25 }
 0x29a   : > { %v1046_v27 = vpop.f32.mrb[0].mxu0 }
 0x29b   : > { %v1416_v28 = vadd.f32 %v1415_v26, %v1046_v27  ;;  %v1412_v29 = vpop.f32.mrb[1].mxu0 }
 0x29c   : > { %v1049_v31 = vpop.f32.mrb[2].mxu0 }
 0x29d   : > { %v1072_v32 = vsub.f32 %v2329_v36, %v1416_v28  ;;  %v1413_v33 = vpop.f32.mrb[3].mxu0 }
 0x29f   : > { %v1073_v34 = vmul.f32 %v1556_v30, %v1072_v32 }
 0x2a1   : > { %v1074_v35 = vadd.f32 %v1416_v28, %v1073_v34 }
 0x2a3   : > { %1075 = vst [vmem:[%s652_s17] sm:$0xff] %v1074_v35 }
 0x2a4   : > { %1774 = shalt.err (!%p1771_p2)
}
 0x2a5   : > { %s1775_s11 = scalar_lea.hbm %s2355_s27, 128  ;;  %s1779_s7 = scalar_lea.hbm %s2485_s28, 256 }
 0x2a6   : > { %p1776_p3 = scmp.ne.s32.totalorder %s2355_s27, %s1775_s11  ;;  %p1780_p8 = scmp.lt.u32.totalorder %s2355_s27, %s2485_s28 }
 0x2a7   : > { %p1781_p13 = scmp.lt.u32.totalorder %s1779_s7, %s1775_s11  ;;  %p1783_p10 = scmp.lt.u32.totalorder %s1775_s11, %s2355_s27 }
 0x2a8   : > { %p1777_p11 = pnand %p1776_p3, %p2486_p12 }
 0x2a9   : > { %p1782_p7 = por %p1781_p13, %p1780_p8 }
 0x2aa   : > { %p1778_p0 = pneg %p1777_p11 }
 0x2ab   : > { %p1784_p1 = por %p1783_p10, %p1782_p7 }
 0x2ad   : > { %p1785_p9 = pnand %p1784_p1, %p1778_p0 }
 0x2af   : > { %1788 = shalt.err (!%p1785_p9)
}
 0x2b0   : > { %1444 = dma.vmem_to_hbm [thread:$0]  (%p2486_p12), %s2357_s21, 128, %s2355_s27, %s1077_s2  }
 0x2b1 PF: > { %s2487_s14 = sld [smem:[#allocation23_spill]]  ;;  %s2488_s23 = sld [smem:[#allocation25_spill]] }
 0x2b2   : > { %p2490_p5 = scmp.ge.s32.totalorder %s1843_s9, 2 }
 0x2b7   : > { %s1102_s15 = sand.u32 1, %s2487_s14   ;;  %p2489_p6 = scmp.ne.s32.totalorder %s2488_s23, 0 }
 0x2b8   : > { %s1103_s19 = scalar_lea.sflag [#allocation6], %s1102_s15 }
 0x2b9   : > { %p1470_p4 = pnand %p2490_p5, %p2489_p6 }
 0x2bb   : > { %1826 = dma.done.wait (!%p1470_p4), %s1103_s19, 128  }
 0x2bc   : > { %1828 = vsyncadd (!%p1470_p4), %s1103_s19, 4294967168  ;;  %s2491_s9 = sld [smem:[#allocation26_spill]]  ;;  %s2492_s16 = sld [smem:[#allocation24_spill]] }
 0x2bd   : > { %s2493_s19 = sld [smem:[#allocation28_spill]]  ;;  %s2494_s17 = smov %s1835_s18 }
 0x2c2   : > { %p36_p2 = scmp.ge.s32.totalorder %s2491_s9, 4   ;;  %s2495_s18 = smov %s2492_s16 }
 0x2c4   :  { %38 = sbr.rel (!%p36_p2) target bundleno = 21 (0x15), region = 177 }
 0x2cb   :  { %1108 = vsyncpa [#allocation5], 1 }
 0x2cc   :  { %1110 = vsyncpa [#allocation5 + $0x1], 1 }
 0x2cd   :  { %1111 = vsyncpa [#allocation8], 1 }
 0x2ce   :  { %1113 = vsyncpa [#allocation8 + $0x1], 1 }
 0x2cf   :  { %1114 = vsyncpa [#allocation11], 1 }
 0x2d0   :  { %1116 = vsyncpa [#allocation11 + $0x1], 1 }
 0x2d1   :  { %1117 = vsyncpa [#allocation14], 1 }
 0x2d2   :  { %1118 = vsyncpa [#allocation6], 1 }
 0x2d3   :  { %1120 = vsyncpa [#allocation6 + $0x1], 1 }

</bundles_post_ra>
